<compile_context>
chip_gen: v7x
topology: tpu7x:2x2x1
jax: 0.10.0
libtpu: 0.0.40
codegen_flags: <defaults>
</compile_context>

<pallas_src>
import functools
import math

import jax
import jax.numpy as jnp
from jax import lax
from jax.experimental import pallas as pl
from jax.experimental.pallas import tpu as pltpu


_SQRT_HALF = 0.7071067811865476


def _gelu_exact(x):
    """erf-GELU via the Abramowitz-Stegun 7.1.26 erf approximation (|err| < 1.5e-7).

    Uses only exp (EUP slot) + polynomial VPU ops, so it does not depend on a native
    erf lowering and keeps the VALU free once the matmuls dominate.
    """
    z = jnp.abs(x) * jnp.float32(_SQRT_HALF)
    t = 1.0 / (1.0 + jnp.float32(0.3275911) * z)
    poly = t * (jnp.float32(0.254829592)
                + t * (jnp.float32(-0.284496736)
                       + t * (jnp.float32(1.421413741)
                              + t * (jnp.float32(-1.453152027)
                                     + t * jnp.float32(1.061405429)))))
    erf_abs = 1.0 - poly * jnp.exp(-z * z)
    erf = jnp.where(x >= 0.0, erf_abs, -erf_abs)
    return 0.5 * x * (1.0 + erf)


def _encoder_block_kernel(x_ref, w1_ref, b1_ref, g1_ref, bt1_ref,
                          w2_ref, b2_ref, g2_ref, bt2_ref,
                          gmat_ref, mnf_ref, mnl_ref, mvalid_ref,
                          o_ref,
                          pad1_ref, patch1_ref, pad2_ref, patch2_ref,
                          *, W, HW, HW_pad, group_size, eps, lpad):
    """One grid step == one image.  Channels-first (C, HW_pad) layout, spatial on lanes."""
    f32 = jnp.float32
    mnf = mnf_ref[...]        # (1, HW_pad) compute dtype: 0 where out-col % W == 0
    mnl = mnl_ref[...]        # (1, HW_pad) compute dtype: 0 where out-col % W == W-1
    mvalid = mvalid_ref[...]  # (1, HW_pad) f32:           0 where out-col >= HW

    def conv3x3(src, pad_ref, patch_ref, w_ref, b_ref):
        # src: (C_src, HW_pad) compute dtype, zeros on the pad columns.
        c_src = src.shape[0]
        # Zero ONLY the two boundary strips of the halo scratch (not the whole thing).
        zeros_strip = jnp.zeros((c_src, lpad), pad_ref.dtype)
        pad_ref[:, 0:lpad] = zeros_strip
        pad_ref[:, lpad + HW_pad:lpad + HW_pad + lpad] = zeros_strip
        pad_ref[:, lpad:lpad + HW_pad] = src
        # im2col patch build: tap k = dy*3+dx -> rows [k*c_src, (k+1)*c_src).
        for dy in range(3):
            for dx in range(3):
                k = dy * 3 + dx
                s = (dy - 1) * W + (dx - 1)                 # flat-index shift of this tap
                v = pad_ref[:, lpad + s:lpad + s + HW_pad]  # (c_src, HW_pad)
                if dx == 0:        # neighbour column x-1: kill output col 0 (row wrap)
                    v = v * mnf
                elif dx == 2:      # neighbour column x+1: kill output col W-1
                    v = v * mnl
                patch_ref[k * c_src:(k + 1) * c_src, :] = v
        # Single big-K MXU matmul (K = 9*c_src), f32 accumulation.
        h = jnp.dot(w_ref[...], patch_ref[...], preferred_element_type=f32)
        h = h + b_ref[...].astype(f32)
        # Zero the pad columns so GN stats and downstream shifted reads stay clean.
        return h * mvalid

    def groupnorm_gelu(h, gamma_ref, beta_ref):
        # Lane reduction first, then a tiny group mix (not a (C,HW)-sized matmul).
        s = jnp.sum(h, axis=1, keepdims=True)          # (C_out, 1)
        ss = jnp.sum(h * h, axis=1, keepdims=True)     # (C_out, 1)
        if group_size == 1:                            # e.g. GroupNorm(32, 32)
            mean = s * jnp.float32(1.0 / HW)
            sqmean = ss * jnp.float32(1.0 / HW)
        else:                                          # gmat folds 1/(group_size*HW)
            gmat = gmat_ref[...]
            mean = jnp.dot(gmat, s, preferred_element_type=f32)
            sqmean = jnp.dot(gmat, ss, preferred_element_type=f32)
        var = jnp.maximum(sqmean - mean * mean, 0.0)
        hn = (h - mean) * lax.rsqrt(var + jnp.float32(eps))
        hn = hn * gamma_ref[...].astype(f32) + beta_ref[...].astype(f32)
        return _gelu_exact(hn) * mvalid

    src1 = x_ref[0]                                    # (C_in, HW_pad) compute dtype
    h = conv3x3(src1, pad1_ref, patch1_ref, w1_ref, b1_ref)
    h = groupnorm_gelu(h, g1_ref, bt1_ref)             # (C_out, HW_pad) f32, masked
    src2 = h.astype(pad2_ref.dtype)
    h = conv3x3(src2, pad2_ref, patch2_ref, w2_ref, b2_ref)
    h = groupnorm_gelu(h, g2_ref, bt2_ref)
    o_ref[0] = h.astype(o_ref.dtype)


@functools.partial(jax.jit,
                   static_argnames=("num_groups", "eps", "pool", "compute_dtype"))
def encoder_block_forward(x, w1, b1, g1, beta1, w2, b2, g2, beta2,
                          *, num_groups=32, eps=1e-5, pool=True,
                          compute_dtype=jnp.bfloat16):
    """Forward of _EncoderBlock (polling=True, bn=False, dropout=False).

    x: (N, C_in, H, W) NCHW.  w1: (C_out, C_in, 3, 3), w2: (C_out, C_out, 3, 3),
    biases / GroupNorm gamma, beta: (C_out,).  Returns (N, C_out, H//2, W//2).
    """
    N, C_in, H0, W0 = x.shape
    C_out = w1.shape[0]
    assert C_out % num_groups == 0, "GroupNorm requires C_out % num_groups == 0"
    group_size = C_out // num_groups
    f32 = jnp.float32

    # AvgPool2d(kernel_size=2, stride=2) (floors odd trailing rows/cols, like torch).
    if pool:
        H, W = H0 // 2, W0 // 2
        xp = x[:, :, :2 * H, :2 * W].reshape(N, C_in, H, 2, W, 2).mean(axis=(3, 5))
    else:
        H, W = H0, W0
        xp = x
    HW = H * W
    HW_pad = ((HW + 127) // 128) * 128        # lane-dense compute / store width
    lpad = ((W + 1 + 127) // 128) * 128       # 128-aligned halo for the shifted reads
    pad_lanes = lpad + HW_pad + lpad

    # Channels-first (C, HW) layout: spatial on lanes, no NCHW<->NHWC HBM transposes.
    x_flat = xp.reshape(N, C_in, HW).astype(compute_dtype)
    if HW_pad != HW:
        x_flat = jnp.pad(x_flat, ((0, 0), (0, 0), (0, HW_pad - HW)))

    # im2col weight layout: w_mat[o, k*C_src + c] = w[o, c, dy, dx], k = dy*3 + dx.
    w1_mat = jnp.transpose(w1, (0, 2, 3, 1)).reshape(C_out, 9 * C_in).astype(compute_dtype)
    w2_mat = jnp.transpose(w2, (0, 2, 3, 1)).reshape(C_out, 9 * C_out).astype(compute_dtype)
    b1c = b1.reshape(C_out, 1).astype(f32)
    b2c = b2.reshape(C_out, 1).astype(f32)
    g1c = g1.reshape(C_out, 1).astype(f32)
    g2c = g2.reshape(C_out, 1).astype(f32)
    bt1c = beta1.reshape(C_out, 1).astype(f32)
    bt2c = beta2.reshape(C_out, 1).astype(f32)

    # Group-mixing matrix (only used when group_size > 1); folds 1/(group_size*HW).
    gid = jnp.arange(C_out) // group_size
    gmat = (gid[:, None] == gid[None, :]).astype(f32) / float(group_size * HW)

    # Output-column masks, precomputed in the wrapper (no in-kernel iota).
    j = jnp.arange(HW_pad)
    col = j % W
    valid = j < HW
    mnf = (valid & (col != 0)).astype(compute_dtype).reshape(1, HW_pad)
    mnl = (valid & (col != W - 1)).astype(compute_dtype).reshape(1, HW_pad)
    mvalid = valid.astype(f32).reshape(1, HW_pad)

    kernel = functools.partial(
        _encoder_block_kernel, W=W, HW=HW, HW_pad=HW_pad,
        group_size=group_size, eps=float(eps), lpad=lpad)

    itemsize = jnp.dtype(compute_dtype).itemsize
    flops = int(N * HW_pad * (2 * C_out * 9 * C_in + 2 * C_out * 9 * C_out + 40 * C_out))
    transcendentals = int(2 * N * C_out * HW_pad)        # exp in the two GELUs
    bytes_accessed = int(N * C_in * HW_pad * itemsize + N * C_out * HW_pad * 4
                         + 9 * C_out * (C_in + C_out) * itemsize
                         + (C_out * C_out + 6 * C_out) * 4 + 3 * HW_pad * 4)

    out_flat = pl.pallas_call(
        kernel,
        out_shape=jax.ShapeDtypeStruct((N, C_out, HW_pad), x.dtype),
        grid_spec=pltpu.PrefetchScalarGridSpec(
            num_scalar_prefetch=0,
            grid=(N,),
            in_specs=[
                pl.BlockSpec((1, C_in, HW_pad), lambda n: (n, 0, 0)),     # x (one image)
                pl.BlockSpec((C_out, 9 * C_in), lambda n: (0, 0)),        # conv1 weights
                pl.BlockSpec((C_out, 1), lambda n: (0, 0)),               # b1
                pl.BlockSpec((C_out, 1), lambda n: (0, 0)),               # gamma1
                pl.BlockSpec((C_out, 1), lambda n: (0, 0)),               # beta1
                pl.BlockSpec((C_out, 9 * C_out), lambda n: (0, 0)),       # conv2 weights
                pl.BlockSpec((C_out, 1), lambda n: (0, 0)),               # b2
                pl.BlockSpec((C_out, 1), lambda n: (0, 0)),               # gamma2
                pl.BlockSpec((C_out, 1), lambda n: (0, 0)),               # beta2
                pl.BlockSpec((C_out, C_out), lambda n: (0, 0)),           # gmat
                pl.BlockSpec((1, HW_pad), lambda n: (0, 0)),              # mask col != 0
                pl.BlockSpec((1, HW_pad), lambda n: (0, 0)),              # mask col != W-1
                pl.BlockSpec((1, HW_pad), lambda n: (0, 0)),              # mask col < HW
            ],
            out_specs=pl.BlockSpec((1, C_out, HW_pad), lambda n: (n, 0, 0)),
            scratch_shapes=[
                pltpu.VMEM((C_in, pad_lanes), compute_dtype),     # conv1 halo scratch
                pltpu.VMEM((9 * C_in, HW_pad), compute_dtype),    # conv1 im2col patches
                pltpu.VMEM((C_out, pad_lanes), compute_dtype),    # conv2 halo scratch
                pltpu.VMEM((9 * C_out, HW_pad), compute_dtype),   # conv2 im2col patches
            ],
        ),
        compiler_params=pltpu.CompilerParams(
            dimension_semantics=("parallel",),
            vmem_limit_bytes=32 * 1024 * 1024,
        ),
        cost_estimate=pl.CostEstimate(flops=flops,
                                      transcendentals=transcendentals,
                                      bytes_accessed=bytes_accessed),
    )(x_flat, w1_mat, b1c, g1c, bt1c, w2_mat, b2c, g2c, bt2c, gmat, mnf, mnl, mvalid)

    return out_flat[:, :, :HW].reshape(N, C_out, H, W)


def init_params(key, in_channels, out_channels, dtype=jnp.float32):
    """Synthetic params matching Conv2d(3x3) / GroupNorm parameter shapes."""
    ks = jax.random.split(key, 8)
    bound1 = 1.0 / math.sqrt(in_channels * 9)
    bound2 = 1.0 / math.sqrt(out_channels * 9)
    w1 = jax.random.uniform(ks[0], (out_channels, in_channels, 3, 3), dtype, -bound1, bound1)
    b1 = jax.random.uniform(ks[1], (out_channels,), dtype, -bound1, bound1)
    g1 = 1.0 + 0.1 * jax.random.normal(ks[2], (out_channels,), dtype)
    beta1 = 0.1 * jax.random.normal(ks[3], (out_channels,), dtype)
    w2 = jax.random.uniform(ks[4], (out_channels, out_channels, 3, 3), dtype, -bound2, bound2)
    b2 = jax.random.uniform(ks[5], (out_channels,), dtype, -bound2, bound2)
    g2 = 1.0 + 0.1 * jax.random.normal(ks[6], (out_channels,), dtype)
    beta2 = 0.1 * jax.random.normal(ks[7], (out_channels,), dtype)
    return w1, b1, g1, beta1, w2, b2, g2, beta2


def _reference(x, w1, b1, g1, beta1, w2, b2, g2, beta2,
               *, num_groups=32, eps=1e-5, pool=True, conv_dtype=jnp.float32):
    """Pure-JAX reference of the PyTorch _EncoderBlock forward.

    conv_dtype lets us build a rounding-matched reference (bf16 conv operands with
    f32 accumulation, exactly the kernel's rounding points) for a tight parity check.
    """
    N, C, H, W = x.shape
    if pool:
        x = x[:, :, :2 * (H // 2), :2 * (W // 2)]
        x = x.reshape(N, C, H // 2, 2, W // 2, 2).mean(axis=(3, 5))

    def conv(z, w, b):
        y = lax.conv_general_dilated(
            z.astype(conv_dtype), w.astype(conv_dtype), (1, 1), ((1, 1), (1, 1)),
            dimension_numbers=("NCHW", "OIHW", "NCHW"),
            preferred_element_type=jnp.float32)
        return y + b[None, :, None, None].astype(jnp.float32)

    def gn(z, gamma, beta):
        n, c, h, w = z.shape
        zg = z.reshape(n, num_groups, c // num_groups, h, w)
        m = zg.mean(axis=(2, 3, 4), keepdims=True)
        v = ((zg - m) ** 2).mean(axis=(2, 3, 4), keepdims=True)
        zn = ((zg - m) / jnp.sqrt(v + eps)).reshape(n, c, h, w)
        return zn * gamma[None, :, None, None] + beta[None, :, None, None]

    def gelu(z):  # exact erf GELU, matching torch.nn.GELU() default
        return 0.5 * z * (1.0 + lax.erf(z * jnp.float32(_SQRT_HALF)))

    h = gelu(gn(conv(x, w1, b1), g1, beta1))
    h = gelu(gn(conv(h, w2, b2), g2, beta2))
    return h


if __name__ == "__main__":
    key = jax.random.PRNGKey(0)
    kx, kp = jax.random.split(key)

    N, C_in, H, W = 2, 4, 16, 16      # spatial 16 -> 8 after the 2x2 avg-pool
    C_out, G = 32, 32                 # GroupNorm(32, out_channels), as in the module

    x = jax.random.normal(kx, (N, C_in, H, W), jnp.float32)
    params = init_params(kp, C_in, C_out)

    out = encoder_block_forward(x, *params, num_groups=G)    # bf16 MXU operands
    out = jax.block_until_ready(out)
    assert out.shape == (N, C_out, H // 2, W // 2), out.shape

    # Tight check vs a rounding-matched reference (bf16 conv operands, f32 accumulation).
    ref_matched = _reference(x, *params, num_groups=G, conv_dtype=jnp.bfloat16)
    err_matched = float(jnp.max(jnp.abs(out - ref_matched)))
    assert err_matched < 5e-3, err_matched
    # Sanity check vs the pure-f32 module reference (bf16 MXU rounding budget).
    ref_f32 = _reference(x, *params, num_groups=G, conv_dtype=jnp.float32)
    err_f32 = float(jnp.max(jnp.abs(out - ref_f32)))
    assert err_f32 < 1e-1, err_f32

    print("KERNEL_OK")
</pallas_src>

<mosaic_0001>
module attributes {stable_mosaic.version = 11 : i64} {
  func.func @_encoder_block_kernel(%arg0: i32, %arg1: memref<1x4x128xbf16, #tpu.memory_space<vmem>>, %arg2: memref<32x36xbf16, #tpu.memory_space<vmem>>, %arg3: memref<32x1xf32, #tpu.memory_space<vmem>>, %arg4: memref<32x1xf32, #tpu.memory_space<vmem>>, %arg5: memref<32x1xf32, #tpu.memory_space<vmem>>, %arg6: memref<32x288xbf16, #tpu.memory_space<vmem>>, %arg7: memref<32x1xf32, #tpu.memory_space<vmem>>, %arg8: memref<32x1xf32, #tpu.memory_space<vmem>>, %arg9: memref<32x1xf32, #tpu.memory_space<vmem>>, %arg10: memref<32x32xf32, #tpu.memory_space<vmem>>, %arg11: memref<1x128xbf16, #tpu.memory_space<vmem>>, %arg12: memref<1x128xbf16, #tpu.memory_space<vmem>>, %arg13: memref<1x128xf32, #tpu.memory_space<vmem>>, %arg14: memref<1x32x128xf32, #tpu.memory_space<vmem>>, %arg15: memref<4x384xbf16, #tpu.memory_space<vmem>>, %arg16: memref<36x128xbf16, #tpu.memory_space<vmem>>, %arg17: memref<32x384xbf16, #tpu.memory_space<vmem>>, %arg18: memref<288x128xbf16, #tpu.memory_space<vmem>>) attributes {dimension_semantics = [#tpu.dimension_semantics<parallel>], iteration_bounds = array<i64: 2>, scalar_prefetch = 0 : i64, scratch_operands = 4 : i64, tpu.core_type = #tpu.core_type<tc>, window_params = [{transform_indices = @transform_0, window_bounds = array<i64: 1, 4, 128>}, {pipeline_mode = #tpu.pipeline_mode<synchronous>, transform_indices = @transform_1, window_bounds = array<i64: 32, 36>}, {pipeline_mode = #tpu.pipeline_mode<synchronous>, transform_indices = @transform_2, window_bounds = array<i64: 32, 1>}, {pipeline_mode = #tpu.pipeline_mode<synchronous>, transform_indices = @transform_3, window_bounds = array<i64: 32, 1>}, {pipeline_mode = #tpu.pipeline_mode<synchronous>, transform_indices = @transform_4, window_bounds = array<i64: 32, 1>}, {pipeline_mode = #tpu.pipeline_mode<synchronous>, transform_indices = @transform_5, window_bounds = array<i64: 32, 288>}, {pipeline_mode = #tpu.pipeline_mode<synchronous>, transform_indices = @transform_6, window_bounds = array<i64: 32, 1>}, {pipeline_mode = #tpu.pipeline_mode<synchronous>, transform_indices = @transform_7, window_bounds = array<i64: 32, 1>}, {pipeline_mode = #tpu.pipeline_mode<synchronous>, transform_indices = @transform_8, window_bounds = array<i64: 32, 1>}, {pipeline_mode = #tpu.pipeline_mode<synchronous>, transform_indices = @transform_9, window_bounds = array<i64: 32, 32>}, {pipeline_mode = #tpu.pipeline_mode<synchronous>, transform_indices = @transform_10, window_bounds = array<i64: 1, 128>}, {pipeline_mode = #tpu.pipeline_mode<synchronous>, transform_indices = @transform_11, window_bounds = array<i64: 1, 128>}, {pipeline_mode = #tpu.pipeline_mode<synchronous>, transform_indices = @transform_12, window_bounds = array<i64: 1, 128>}, {transform_indices = @transform_13, window_bounds = array<i64: 1, 32, 128>}]} {
    %c0 = arith.constant 0 : index
    %c0_0 = arith.constant 0 : index
    %0 = vector.load %arg11[%c0, %c0_0] : memref<1x128xbf16, #tpu.memory_space<vmem>>, vector<1x128xbf16>
    %c0_1 = arith.constant 0 : index
    %c0_2 = arith.constant 0 : index
    %1 = vector.load %arg12[%c0_1, %c0_2] : memref<1x128xbf16, #tpu.memory_space<vmem>>, vector<1x128xbf16>
    %c0_3 = arith.constant 0 : index
    %c0_4 = arith.constant 0 : index
    %2 = vector.load %arg13[%c0_3, %c0_4] : memref<1x128xf32, #tpu.memory_space<vmem>>, vector<1x128xf32>
    %c0_5 = arith.constant 0 : index
    %c0_6 = arith.constant 0 : index
    %c0_7 = arith.constant 0 : index
    %3 = vector.load %arg1[%c0_5, %c0_6, %c0_7] : memref<1x4x128xbf16, #tpu.memory_space<vmem>>, vector<1x4x128xbf16>
    %4 = vector.shape_cast %3 : vector<1x4x128xbf16> to vector<4x128xbf16>
    %cst = arith.constant 0.000000e+00 : bf16
    %5 = vector.broadcast %cst : bf16 to vector<4x128xbf16>
    %c0_8 = arith.constant 0 : index
    %c0_9 = arith.constant 0 : index
    %6 = vector.load %arg15[%c0_8, %c0_9] : memref<4x384xbf16, #tpu.memory_space<vmem>>, vector<4x128xbf16>
    tpu.vector_store %arg15[%c0_8, %c0_9], %5 {strides = array<i32>} : memref<4x384xbf16, #tpu.memory_space<vmem>>, vector<4x128xbf16>,
    %c0_10 = arith.constant 0 : index
    %c256 = arith.constant 256 : index
    %7 = vector.load %arg15[%c0_10, %c256] : memref<4x384xbf16, #tpu.memory_space<vmem>>, vector<4x128xbf16>
    tpu.vector_store %arg15[%c0_10, %c256], %5 {strides = array<i32>} : memref<4x384xbf16, #tpu.memory_space<vmem>>, vector<4x128xbf16>,
    %c0_11 = arith.constant 0 : index
    %c128 = arith.constant 128 : index
    %8 = vector.load %arg15[%c0_11, %c128] : memref<4x384xbf16, #tpu.memory_space<vmem>>, vector<4x128xbf16>
    tpu.vector_store %arg15[%c0_11, %c128], %4 {strides = array<i32>} : memref<4x384xbf16, #tpu.memory_space<vmem>>, vector<4x128xbf16>,
    %c0_12 = arith.constant 0 : index
    %c119 = arith.constant 119 : index
    %9 = vector.load %arg15[%c0_12, %c119] : memref<4x384xbf16, #tpu.memory_space<vmem>>, vector<4x128xbf16>
    %10 = vector.broadcast %0 : vector<1x128xbf16> to vector<4x128xbf16>
    %11 = arith.mulf %9, %10 : vector<4x128xbf16>
    %c0_13 = arith.constant 0 : index
    %c0_14 = arith.constant 0 : index
    %12 = vector.load %arg16[%c0_13, %c0_14] : memref<36x128xbf16, #tpu.memory_space<vmem>>, vector<4x128xbf16>
    tpu.vector_store %arg16[%c0_13, %c0_14], %11 {strides = array<i32>} : memref<36x128xbf16, #tpu.memory_space<vmem>>, vector<4x128xbf16>,
    %c0_15 = arith.constant 0 : index
    %c120 = arith.constant 120 : index
    %13 = vector.load %arg15[%c0_15, %c120] : memref<4x384xbf16, #tpu.memory_space<vmem>>, vector<4x128xbf16>
    %c4 = arith.constant 4 : index
    %c0_16 = arith.constant 0 : index
    %14 = vector.load %arg16[%c4, %c0_16] : memref<36x128xbf16, #tpu.memory_space<vmem>>, vector<4x128xbf16>
    tpu.vector_store %arg16[%c4, %c0_16], %13 {strides = array<i32>} : memref<36x128xbf16, #tpu.memory_space<vmem>>, vector<4x128xbf16>,
    %c0_17 = arith.constant 0 : index
    %c121 = arith.constant 121 : index
    %15 = vector.load %arg15[%c0_17, %c121] : memref<4x384xbf16, #tpu.memory_space<vmem>>, vector<4x128xbf16>
    %16 = vector.broadcast %1 : vector<1x128xbf16> to vector<4x128xbf16>
    %17 = arith.mulf %15, %16 : vector<4x128xbf16>
    %c8 = arith.constant 8 : index
    %c0_18 = arith.constant 0 : index
    %18 = vector.load %arg16[%c8, %c0_18] : memref<36x128xbf16, #tpu.memory_space<vmem>>, vector<4x128xbf16>
    tpu.vector_store %arg16[%c8, %c0_18], %17 {strides = array<i32>} : memref<36x128xbf16, #tpu.memory_space<vmem>>, vector<4x128xbf16>,
    %c0_19 = arith.constant 0 : index
    %c127 = arith.constant 127 : index
    %19 = vector.load %arg15[%c0_19, %c127] : memref<4x384xbf16, #tpu.memory_space<vmem>>, vector<4x128xbf16>
    %20 = vector.broadcast %0 : vector<1x128xbf16> to vector<4x128xbf16>
    %21 = arith.mulf %19, %20 : vector<4x128xbf16>
    %c12 = arith.constant 12 : index
    %c0_20 = arith.constant 0 : index
    %22 = vector.load %arg16[%c12, %c0_20] : memref<36x128xbf16, #tpu.memory_space<vmem>>, vector<4x128xbf16>
    tpu.vector_store %arg16[%c12, %c0_20], %21 {strides = array<i32>} : memref<36x128xbf16, #tpu.memory_space<vmem>>, vector<4x128xbf16>,
    %c0_21 = arith.constant 0 : index
    %c128_22 = arith.constant 128 : index
    %23 = vector.load %arg15[%c0_21, %c128_22] : memref<4x384xbf16, #tpu.memory_space<vmem>>, vector<4x128xbf16>
    %c16 = arith.constant 16 : index
    %c0_23 = arith.constant 0 : index
    %24 = vector.load %arg16[%c16, %c0_23] : memref<36x128xbf16, #tpu.memory_space<vmem>>, vector<4x128xbf16>
    tpu.vector_store %arg16[%c16, %c0_23], %23 {strides = array<i32>} : memref<36x128xbf16, #tpu.memory_space<vmem>>, vector<4x128xbf16>,
    %c0_24 = arith.constant 0 : index
    %c129 = arith.constant 129 : index
    %25 = vector.load %arg15[%c0_24, %c129] : memref<4x384xbf16, #tpu.memory_space<vmem>>, vector<4x128xbf16>
    %26 = vector.broadcast %1 : vector<1x128xbf16> to vector<4x128xbf16>
    %27 = arith.mulf %25, %26 : vector<4x128xbf16>
    %c20 = arith.constant 20 : index
    %c0_25 = arith.constant 0 : index
    %28 = vector.load %arg16[%c20, %c0_25] : memref<36x128xbf16, #tpu.memory_space<vmem>>, vector<4x128xbf16>
    tpu.vector_store %arg16[%c20, %c0_25], %27 {strides = array<i32>} : memref<36x128xbf16, #tpu.memory_space<vmem>>, vector<4x128xbf16>,
    %c0_26 = arith.constant 0 : index
    %c135 = arith.constant 135 : index
    %29 = vector.load %arg15[%c0_26, %c135] : memref<4x384xbf16, #tpu.memory_space<vmem>>, vector<4x128xbf16>
    %30 = vector.broadcast %0 : vector<1x128xbf16> to vector<4x128xbf16>
    %31 = arith.mulf %29, %30 : vector<4x128xbf16>
    %c24 = arith.constant 24 : index
    %c0_27 = arith.constant 0 : index
    %32 = vector.load %arg16[%c24, %c0_27] : memref<36x128xbf16, #tpu.memory_space<vmem>>, vector<4x128xbf16>
    tpu.vector_store %arg16[%c24, %c0_27], %31 {strides = array<i32>} : memref<36x128xbf16, #tpu.memory_space<vmem>>, vector<4x128xbf16>,
    %c0_28 = arith.constant 0 : index
    %c136 = arith.constant 136 : index
    %33 = vector.load %arg15[%c0_28, %c136] : memref<4x384xbf16, #tpu.memory_space<vmem>>, vector<4x128xbf16>
    %c28 = arith.constant 28 : index
    %c0_29 = arith.constant 0 : index
    %34 = vector.load %arg16[%c28, %c0_29] : memref<36x128xbf16, #tpu.memory_space<vmem>>, vector<4x128xbf16>
    tpu.vector_store %arg16[%c28, %c0_29], %33 {strides = array<i32>} : memref<36x128xbf16, #tpu.memory_space<vmem>>, vector<4x128xbf16>,
    %c0_30 = arith.constant 0 : index
    %c137 = arith.constant 137 : index
    %35 = vector.load %arg15[%c0_30, %c137] : memref<4x384xbf16, #tpu.memory_space<vmem>>, vector<4x128xbf16>
    %36 = vector.broadcast %1 : vector<1x128xbf16> to vector<4x128xbf16>
    %37 = arith.mulf %35, %36 : vector<4x128xbf16>
    %c32 = arith.constant 32 : index
    %c0_31 = arith.constant 0 : index
    %38 = vector.load %arg16[%c32, %c0_31] : memref<36x128xbf16, #tpu.memory_space<vmem>>, vector<4x128xbf16>
    tpu.vector_store %arg16[%c32, %c0_31], %37 {strides = array<i32>} : memref<36x128xbf16, #tpu.memory_space<vmem>>, vector<4x128xbf16>,
    %c0_32 = arith.constant 0 : index
    %c0_33 = arith.constant 0 : index
    %39 = vector.load %arg2[%c0_32, %c0_33] : memref<32x36xbf16, #tpu.memory_space<vmem>>, vector<32x36xbf16>
    %c0_34 = arith.constant 0 : index
    %c0_35 = arith.constant 0 : index
    %40 = vector.load %arg16[%c0_34, %c0_35] : memref<36x128xbf16, #tpu.memory_space<vmem>>, vector<36x128xbf16>
    %cst_36 = arith.constant dense<0.000000e+00> : vector<32x128xf32>
    %41 = tpu.matmul %39, %40, %cst_36 {dimension_numbers = #tpu.dot_dimension_numbers<[1], [0], [0], [1], [0, 0, 1, 1], [], []>} : vector<32x36xbf16>, vector<36x128xbf16>, vector<32x128xf32> -> vector<32x128xf32>
    %c0_37 = arith.constant 0 : index
    %c0_38 = arith.constant 0 : index
    %42 = vector.load %arg3[%c0_37, %c0_38] : memref<32x1xf32, #tpu.memory_space<vmem>>, vector<32x1xf32>
    %43 = vector.broadcast %42 : vector<32x1xf32> to vector<32x128xf32>
    %44 = arith.addf %41, %43 : vector<32x128xf32>
    %45 = vector.broadcast %2 : vector<1x128xf32> to vector<32x128xf32>
    %46 = arith.mulf %44, %45 : vector<32x128xf32>
    %cst_39 = arith.constant dense<0.000000e+00> : vector<32xf32>
    %47 = vector.multi_reduction <add>, %46, %cst_39 [1] : vector<32x128xf32> to vector<32xf32>
    %48 = vector.shape_cast %47 : vector<32xf32> to vector<32x1xf32>
    %49 = arith.mulf %46, %46 : vector<32x128xf32>
    %cst_40 = arith.constant dense<0.000000e+00> : vector<32xf32>
    %50 = vector.multi_reduction <add>, %49, %cst_40 [1] : vector<32x128xf32> to vector<32xf32>
    %51 = vector.shape_cast %50 : vector<32xf32> to vector<32x1xf32>
    %cst_41 = arith.constant 1.562500e-02 : f32
    %52 = vector.broadcast %cst_41 : f32 to vector<32x1xf32>
    %53 = arith.mulf %48, %52 : vector<32x1xf32>
    %cst_42 = arith.constant 1.562500e-02 : f32
    %54 = vector.broadcast %cst_42 : f32 to vector<32x1xf32>
    %55 = arith.mulf %51, %54 : vector<32x1xf32>
    %56 = arith.mulf %53, %53 : vector<32x1xf32>
    %57 = arith.subf %55, %56 : vector<32x1xf32>
    %cst_43 = arith.constant 0.000000e+00 : f32
    %58 = vector.broadcast %cst_43 : f32 to vector<32x1xf32>
    %59 = arith.maximumf %57, %58 : vector<32x1xf32>
    %60 = vector.broadcast %53 : vector<32x1xf32> to vector<32x128xf32>
    %61 = arith.subf %46, %60 : vector<32x128xf32>
    %cst_44 = arith.constant 9.99999974E-6 : f32
    %62 = vector.broadcast %cst_44 : f32 to vector<32x1xf32>
    %63 = arith.addf %59, %62 : vector<32x1xf32>
    %64 = math.rsqrt %63 : vector<32x1xf32>
    %65 = vector.broadcast %64 : vector<32x1xf32> to vector<32x128xf32>
    %66 = arith.mulf %61, %65 : vector<32x128xf32>
    %c0_45 = arith.constant 0 : index
    %c0_46 = arith.constant 0 : index
    %67 = vector.load %arg4[%c0_45, %c0_46] : memref<32x1xf32, #tpu.memory_space<vmem>>, vector<32x1xf32>
    %68 = vector.broadcast %67 : vector<32x1xf32> to vector<32x128xf32>
    %69 = arith.mulf %66, %68 : vector<32x128xf32>
    %c0_47 = arith.constant 0 : index
    %c0_48 = arith.constant 0 : index
    %70 = vector.load %arg5[%c0_47, %c0_48] : memref<32x1xf32, #tpu.memory_space<vmem>>, vector<32x1xf32>
    %71 = vector.broadcast %70 : vector<32x1xf32> to vector<32x128xf32>
    %72 = arith.addf %69, %71 : vector<32x128xf32>
    %73 = math.absf %72 : vector<32x128xf32>
    %cst_49 = arith.constant 0.707106769 : f32
    %74 = vector.broadcast %cst_49 : f32 to vector<32x128xf32>
    %75 = arith.mulf %73, %74 : vector<32x128xf32>
    %cst_50 = arith.constant 0.327591091 : f32
    %76 = vector.broadcast %cst_50 : f32 to vector<32x128xf32>
    %77 = arith.mulf %76, %75 : vector<32x128xf32>
    %cst_51 = arith.constant 1.000000e+00 : f32
    %78 = vector.broadcast %cst_51 : f32 to vector<32x128xf32>
    %79 = arith.addf %78, %77 : vector<32x128xf32>
    %cst_52 = arith.constant 1.000000e+00 : f32
    %80 = vector.broadcast %cst_52 : f32 to vector<32x128xf32>
    %81 = arith.divf %80, %79 : vector<32x128xf32>
    %cst_53 = arith.constant 1.06140542 : f32
    %82 = vector.broadcast %cst_53 : f32 to vector<32x128xf32>
    %83 = arith.mulf %81, %82 : vector<32x128xf32>
    %cst_54 = arith.constant -1.45315206 : f32
    %84 = vector.broadcast %cst_54 : f32 to vector<32x128xf32>
    %85 = arith.addf %84, %83 : vector<32x128xf32>
    %86 = arith.mulf %81, %85 : vector<32x128xf32>
    %cst_55 = arith.constant 1.42141378 : f32
    %87 = vector.broadcast %cst_55 : f32 to vector<32x128xf32>
    %88 = arith.addf %87, %86 : vector<32x128xf32>
    %89 = arith.mulf %81, %88 : vector<32x128xf32>
    %cst_56 = arith.constant -0.284496725 : f32
    %90 = vector.broadcast %cst_56 : f32 to vector<32x128xf32>
    %91 = arith.addf %90, %89 : vector<32x128xf32>
    %92 = arith.mulf %81, %91 : vector<32x128xf32>
    %cst_57 = arith.constant 0.254829586 : f32
    %93 = vector.broadcast %cst_57 : f32 to vector<32x128xf32>
    %94 = arith.addf %93, %92 : vector<32x128xf32>
    %95 = arith.mulf %81, %94 : vector<32x128xf32>
    %cst_58 = arith.constant 0.000000e+00 : f32
    %96 = vector.broadcast %cst_58 : f32 to vector<32x128xf32>
    %97 = arith.subf %96, %75 : vector<32x128xf32>
    %98 = arith.mulf %97, %75 : vector<32x128xf32>
    %99 = math.exp %98 : vector<32x128xf32>
    %100 = arith.mulf %95, %99 : vector<32x128xf32>
    %cst_59 = arith.constant 1.000000e+00 : f32
    %101 = vector.broadcast %cst_59 : f32 to vector<32x128xf32>
    %102 = arith.subf %101, %100 : vector<32x128xf32>
    %cst_60 = arith.constant 0.000000e+00 : f32
    %103 = vector.broadcast %cst_60 : f32 to vector<32x128xf32>
    %104 = arith.cmpf oge, %72, %103 : vector<32x128xf32>
    %cst_61 = arith.constant 0.000000e+00 : f32
    %105 = vector.broadcast %cst_61 : f32 to vector<32x128xf32>
    %106 = arith.subf %105, %102 : vector<32x128xf32>
    %107 = arith.select %104, %102, %106 : vector<32x128xi1>, vector<32x128xf32>
    %cst_62 = arith.constant 5.000000e-01 : f32
    %108 = vector.broadcast %cst_62 : f32 to vector<32x128xf32>
    %109 = arith.mulf %108, %72 : vector<32x128xf32>
    %cst_63 = arith.constant 1.000000e+00 : f32
    %110 = vector.broadcast %cst_63 : f32 to vector<32x128xf32>
    %111 = arith.addf %110, %107 : vector<32x128xf32>
    %112 = arith.mulf %109, %111 : vector<32x128xf32>
    %113 = vector.broadcast %2 : vector<1x128xf32> to vector<32x128xf32>
    %114 = arith.mulf %112, %113 : vector<32x128xf32>
    %115 = arith.truncf %114 : vector<32x128xf32> to vector<32x128xbf16>
    %cst_64 = arith.constant 0.000000e+00 : bf16
    %116 = vector.broadcast %cst_64 : bf16 to vector<32x128xbf16>
    %c0_65 = arith.constant 0 : index
    %c0_66 = arith.constant 0 : index
    %117 = vector.load %arg17[%c0_65, %c0_66] : memref<32x384xbf16, #tpu.memory_space<vmem>>, vector<32x128xbf16>
    tpu.vector_store %arg17[%c0_65, %c0_66], %116 {strides = array<i32>} : memref<32x384xbf16, #tpu.memory_space<vmem>>, vector<32x128xbf16>,
    %c0_67 = arith.constant 0 : index
    %c256_68 = arith.constant 256 : index
    %118 = vector.load %arg17[%c0_67, %c256_68] : memref<32x384xbf16, #tpu.memory_space<vmem>>, vector<32x128xbf16>
    tpu.vector_store %arg17[%c0_67, %c256_68], %116 {strides = array<i32>} : memref<32x384xbf16, #tpu.memory_space<vmem>>, vector<32x128xbf16>,
    %c0_69 = arith.constant 0 : index
    %c128_70 = arith.constant 128 : index
    %119 = vector.load %arg17[%c0_69, %c128_70] : memref<32x384xbf16, #tpu.memory_space<vmem>>, vector<32x128xbf16>
    tpu.vector_store %arg17[%c0_69, %c128_70], %115 {strides = array<i32>} : memref<32x384xbf16, #tpu.memory_space<vmem>>, vector<32x128xbf16>,
    %c0_71 = arith.constant 0 : index
    %c119_72 = arith.constant 119 : index
    %120 = vector.load %arg17[%c0_71, %c119_72] : memref<32x384xbf16, #tpu.memory_space<vmem>>, vector<32x128xbf16>
    %121 = vector.broadcast %0 : vector<1x128xbf16> to vector<32x128xbf16>
    %122 = arith.mulf %120, %121 : vector<32x128xbf16>
    %c0_73 = arith.constant 0 : index
    %c0_74 = arith.constant 0 : index
    %123 = vector.load %arg18[%c0_73, %c0_74] : memref<288x128xbf16, #tpu.memory_space<vmem>>, vector<32x128xbf16>
    tpu.vector_store %arg18[%c0_73, %c0_74], %122 {strides = array<i32>} : memref<288x128xbf16, #tpu.memory_space<vmem>>, vector<32x128xbf16>,
    %c0_75 = arith.constant 0 : index
    %c120_76 = arith.constant 120 : index
    %124 = vector.load %arg17[%c0_75, %c120_76] : memref<32x384xbf16, #tpu.memory_space<vmem>>, vector<32x128xbf16>
    %c32_77 = arith.constant 32 : index
    %c0_78 = arith.constant 0 : index
    %125 = vector.load %arg18[%c32_77, %c0_78] : memref<288x128xbf16, #tpu.memory_space<vmem>>, vector<32x128xbf16>
    tpu.vector_store %arg18[%c32_77, %c0_78], %124 {strides = array<i32>} : memref<288x128xbf16, #tpu.memory_space<vmem>>, vector<32x128xbf16>,
    %c0_79 = arith.constant 0 : index
    %c121_80 = arith.constant 121 : index
    %126 = vector.load %arg17[%c0_79, %c121_80] : memref<32x384xbf16, #tpu.memory_space<vmem>>, vector<32x128xbf16>
    %127 = vector.broadcast %1 : vector<1x128xbf16> to vector<32x128xbf16>
    %128 = arith.mulf %126, %127 : vector<32x128xbf16>
    %c64 = arith.constant 64 : index
    %c0_81 = arith.constant 0 : index
    %129 = vector.load %arg18[%c64, %c0_81] : memref<288x128xbf16, #tpu.memory_space<vmem>>, vector<32x128xbf16>
    tpu.vector_store %arg18[%c64, %c0_81], %128 {strides = array<i32>} : memref<288x128xbf16, #tpu.memory_space<vmem>>, vector<32x128xbf16>,
    %c0_82 = arith.constant 0 : index
    %c127_83 = arith.constant 127 : index
    %130 = vector.load %arg17[%c0_82, %c127_83] : memref<32x384xbf16, #tpu.memory_space<vmem>>, vector<32x128xbf16>
    %131 = vector.broadcast %0 : vector<1x128xbf16> to vector<32x128xbf16>
    %132 = arith.mulf %130, %131 : vector<32x128xbf16>
    %c96 = arith.constant 96 : index
    %c0_84 = arith.constant 0 : index
    %133 = vector.load %arg18[%c96, %c0_84] : memref<288x128xbf16, #tpu.memory_space<vmem>>, vector<32x128xbf16>
    tpu.vector_store %arg18[%c96, %c0_84], %132 {strides = array<i32>} : memref<288x128xbf16, #tpu.memory_space<vmem>>, vector<32x128xbf16>,
    %c0_85 = arith.constant 0 : index
    %c128_86 = arith.constant 128 : index
    %134 = vector.load %arg17[%c0_85, %c128_86] : memref<32x384xbf16, #tpu.memory_space<vmem>>, vector<32x128xbf16>
    %c128_87 = arith.constant 128 : index
    %c0_88 = arith.constant 0 : index
    %135 = vector.load %arg18[%c128_87, %c0_88] : memref<288x128xbf16, #tpu.memory_space<vmem>>, vector<32x128xbf16>
    tpu.vector_store %arg18[%c128_87, %c0_88], %134 {strides = array<i32>} : memref<288x128xbf16, #tpu.memory_space<vmem>>, vector<32x128xbf16>,
    %c0_89 = arith.constant 0 : index
    %c129_90 = arith.constant 129 : index
    %136 = vector.load %arg17[%c0_89, %c129_90] : memref<32x384xbf16, #tpu.memory_space<vmem>>, vector<32x128xbf16>
    %137 = vector.broadcast %1 : vector<1x128xbf16> to vector<32x128xbf16>
    %138 = arith.mulf %136, %137 : vector<32x128xbf16>
    %c160 = arith.constant 160 : index
    %c0_91 = arith.constant 0 : index
    %139 = vector.load %arg18[%c160, %c0_91] : memref<288x128xbf16, #tpu.memory_space<vmem>>, vector<32x128xbf16>
    tpu.vector_store %arg18[%c160, %c0_91], %138 {strides = array<i32>} : memref<288x128xbf16, #tpu.memory_space<vmem>>, vector<32x128xbf16>,
    %c0_92 = arith.constant 0 : index
    %c135_93 = arith.constant 135 : index
    %140 = vector.load %arg17[%c0_92, %c135_93] : memref<32x384xbf16, #tpu.memory_space<vmem>>, vector<32x128xbf16>
    %141 = vector.broadcast %0 : vector<1x128xbf16> to vector<32x128xbf16>
    %142 = arith.mulf %140, %141 : vector<32x128xbf16>
    %c192 = arith.constant 192 : index
    %c0_94 = arith.constant 0 : index
    %143 = vector.load %arg18[%c192, %c0_94] : memref<288x128xbf16, #tpu.memory_space<vmem>>, vector<32x128xbf16>
    tpu.vector_store %arg18[%c192, %c0_94], %142 {strides = array<i32>} : memref<288x128xbf16, #tpu.memory_space<vmem>>, vector<32x128xbf16>,
    %c0_95 = arith.constant 0 : index
    %c136_96 = arith.constant 136 : index
    %144 = vector.load %arg17[%c0_95, %c136_96] : memref<32x384xbf16, #tpu.memory_space<vmem>>, vector<32x128xbf16>
    %c224 = arith.constant 224 : index
    %c0_97 = arith.constant 0 : index
    %145 = vector.load %arg18[%c224, %c0_97] : memref<288x128xbf16, #tpu.memory_space<vmem>>, vector<32x128xbf16>
    tpu.vector_store %arg18[%c224, %c0_97], %144 {strides = array<i32>} : memref<288x128xbf16, #tpu.memory_space<vmem>>, vector<32x128xbf16>,
    %c0_98 = arith.constant 0 : index
    %c137_99 = arith.constant 137 : index
    %146 = vector.load %arg17[%c0_98, %c137_99] : memref<32x384xbf16, #tpu.memory_space<vmem>>, vector<32x128xbf16>
    %147 = vector.broadcast %1 : vector<1x128xbf16> to vector<32x128xbf16>
    %148 = arith.mulf %146, %147 : vector<32x128xbf16>
    %c256_100 = arith.constant 256 : index
    %c0_101 = arith.constant 0 : index
    %149 = vector.load %arg18[%c256_100, %c0_101] : memref<288x128xbf16, #tpu.memory_space<vmem>>, vector<32x128xbf16>
    tpu.vector_store %arg18[%c256_100, %c0_101], %148 {strides = array<i32>} : memref<288x128xbf16, #tpu.memory_space<vmem>>, vector<32x128xbf16>,
    %c0_102 = arith.constant 0 : index
    %c0_103 = arith.constant 0 : index
    %150 = vector.load %arg6[%c0_102, %c0_103] : memref<32x288xbf16, #tpu.memory_space<vmem>>, vector<32x288xbf16>
    %c0_104 = arith.constant 0 : index
    %c0_105 = arith.constant 0 : index
    %151 = vector.load %arg18[%c0_104, %c0_105] : memref<288x128xbf16, #tpu.memory_space<vmem>>, vector<288x128xbf16>
    %cst_106 = arith.constant dense<0.000000e+00> : vector<32x128xf32>
    %152 = tpu.matmul %150, %151, %cst_106 {dimension_numbers = #tpu.dot_dimension_numbers<[1], [0], [0], [1], [0, 0, 1, 1], [], []>} : vector<32x288xbf16>, vector<288x128xbf16>, vector<32x128xf32> -> vector<32x128xf32>
    %c0_107 = arith.constant 0 : index
    %c0_108 = arith.constant 0 : index
    %153 = vector.load %arg7[%c0_107, %c0_108] : memref<32x1xf32, #tpu.memory_space<vmem>>, vector<32x1xf32>
    %154 = vector.broadcast %153 : vector<32x1xf32> to vector<32x128xf32>
    %155 = arith.addf %152, %154 : vector<32x128xf32>
    %156 = vector.broadcast %2 : vector<1x128xf32> to vector<32x128xf32>
    %157 = arith.mulf %155, %156 : vector<32x128xf32>
    %cst_109 = arith.constant dense<0.000000e+00> : vector<32xf32>
    %158 = vector.multi_reduction <add>, %157, %cst_109 [1] : vector<32x128xf32> to vector<32xf32>
    %159 = vector.shape_cast %158 : vector<32xf32> to vector<32x1xf32>
    %160 = arith.mulf %157, %157 : vector<32x128xf32>
    %cst_110 = arith.constant dense<0.000000e+00> : vector<32xf32>
    %161 = vector.multi_reduction <add>, %160, %cst_110 [1] : vector<32x128xf32> to vector<32xf32>
    %162 = vector.shape_cast %161 : vector<32xf32> to vector<32x1xf32>
    %cst_111 = arith.constant 1.562500e-02 : f32
    %163 = vector.broadcast %cst_111 : f32 to vector<32x1xf32>
    %164 = arith.mulf %159, %163 : vector<32x1xf32>
    %cst_112 = arith.constant 1.562500e-02 : f32
    %165 = vector.broadcast %cst_112 : f32 to vector<32x1xf32>
    %166 = arith.mulf %162, %165 : vector<32x1xf32>
    %167 = arith.mulf %164, %164 : vector<32x1xf32>
    %168 = arith.subf %166, %167 : vector<32x1xf32>
    %cst_113 = arith.constant 0.000000e+00 : f32
    %169 = vector.broadcast %cst_113 : f32 to vector<32x1xf32>
    %170 = arith.maximumf %168, %169 : vector<32x1xf32>
    %171 = vector.broadcast %164 : vector<32x1xf32> to vector<32x128xf32>
    %172 = arith.subf %157, %171 : vector<32x128xf32>
    %cst_114 = arith.constant 9.99999974E-6 : f32
    %173 = vector.broadcast %cst_114 : f32 to vector<32x1xf32>
    %174 = arith.addf %170, %173 : vector<32x1xf32>
    %175 = math.rsqrt %174 : vector<32x1xf32>
    %176 = vector.broadcast %175 : vector<32x1xf32> to vector<32x128xf32>
    %177 = arith.mulf %172, %176 : vector<32x128xf32>
    %c0_115 = arith.constant 0 : index
    %c0_116 = arith.constant 0 : index
    %178 = vector.load %arg8[%c0_115, %c0_116] : memref<32x1xf32, #tpu.memory_space<vmem>>, vector<32x1xf32>
    %179 = vector.broadcast %178 : vector<32x1xf32> to vector<32x128xf32>
    %180 = arith.mulf %177, %179 : vector<32x128xf32>
    %c0_117 = arith.constant 0 : index
    %c0_118 = arith.constant 0 : index
    %181 = vector.load %arg9[%c0_117, %c0_118] : memref<32x1xf32, #tpu.memory_space<vmem>>, vector<32x1xf32>
    %182 = vector.broadcast %181 : vector<32x1xf32> to vector<32x128xf32>
    %183 = arith.addf %180, %182 : vector<32x128xf32>
    %184 = math.absf %183 : vector<32x128xf32>
    %cst_119 = arith.constant 0.707106769 : f32
    %185 = vector.broadcast %cst_119 : f32 to vector<32x128xf32>
    %186 = arith.mulf %184, %185 : vector<32x128xf32>
    %cst_120 = arith.constant 0.327591091 : f32
    %187 = vector.broadcast %cst_120 : f32 to vector<32x128xf32>
    %188 = arith.mulf %187, %186 : vector<32x128xf32>
    %cst_121 = arith.constant 1.000000e+00 : f32
    %189 = vector.broadcast %cst_121 : f32 to vector<32x128xf32>
    %190 = arith.addf %189, %188 : vector<32x128xf32>
    %cst_122 = arith.constant 1.000000e+00 : f32
    %191 = vector.broadcast %cst_122 : f32 to vector<32x128xf32>
    %192 = arith.divf %191, %190 : vector<32x128xf32>
    %cst_123 = arith.constant 1.06140542 : f32
    %193 = vector.broadcast %cst_123 : f32 to vector<32x128xf32>
    %194 = arith.mulf %192, %193 : vector<32x128xf32>
    %cst_124 = arith.constant -1.45315206 : f32
    %195 = vector.broadcast %cst_124 : f32 to vector<32x128xf32>
    %196 = arith.addf %195, %194 : vector<32x128xf32>
    %197 = arith.mulf %192, %196 : vector<32x128xf32>
    %cst_125 = arith.constant 1.42141378 : f32
    %198 = vector.broadcast %cst_125 : f32 to vector<32x128xf32>
    %199 = arith.addf %198, %197 : vector<32x128xf32>
    %200 = arith.mulf %192, %199 : vector<32x128xf32>
    %cst_126 = arith.constant -0.284496725 : f32
    %201 = vector.broadcast %cst_126 : f32 to vector<32x128xf32>
    %202 = arith.addf %201, %200 : vector<32x128xf32>
    %203 = arith.mulf %192, %202 : vector<32x128xf32>
    %cst_127 = arith.constant 0.254829586 : f32
    %204 = vector.broadcast %cst_127 : f32 to vector<32x128xf32>
    %205 = arith.addf %204, %203 : vector<32x128xf32>
    %206 = arith.mulf %192, %205 : vector<32x128xf32>
    %cst_128 = arith.constant 0.000000e+00 : f32
    %207 = vector.broadcast %cst_128 : f32 to vector<32x128xf32>
    %208 = arith.subf %207, %186 : vector<32x128xf32>
    %209 = arith.mulf %208, %186 : vector<32x128xf32>
    %210 = math.exp %209 : vector<32x128xf32>
    %211 = arith.mulf %206, %210 : vector<32x128xf32>
    %cst_129 = arith.constant 1.000000e+00 : f32
    %212 = vector.broadcast %cst_129 : f32 to vector<32x128xf32>
    %213 = arith.subf %212, %211 : vector<32x128xf32>
    %cst_130 = arith.constant 0.000000e+00 : f32
    %214 = vector.broadcast %cst_130 : f32 to vector<32x128xf32>
    %215 = arith.cmpf oge, %183, %214 : vector<32x128xf32>
    %cst_131 = arith.constant 0.000000e+00 : f32
    %216 = vector.broadcast %cst_131 : f32 to vector<32x128xf32>
    %217 = arith.subf %216, %213 : vector<32x128xf32>
    %218 = arith.select %215, %213, %217 : vector<32x128xi1>, vector<32x128xf32>
    %cst_132 = arith.constant 5.000000e-01 : f32
    %219 = vector.broadcast %cst_132 : f32 to vector<32x128xf32>
    %220 = arith.mulf %219, %183 : vector<32x128xf32>
    %cst_133 = arith.constant 1.000000e+00 : f32
    %221 = vector.broadcast %cst_133 : f32 to vector<32x128xf32>
    %222 = arith.addf %221, %218 : vector<32x128xf32>
    %223 = arith.mulf %220, %222 : vector<32x128xf32>
    %224 = vector.broadcast %2 : vector<1x128xf32> to vector<32x128xf32>
    %225 = arith.mulf %223, %224 : vector<32x128xf32>
    %c0_134 = arith.constant 0 : index
    %c0_135 = arith.constant 0 : index
    %c0_136 = arith.constant 0 : index
    %226 = vector.load %arg14[%c0_134, %c0_135, %c0_136] : memref<1x32x128xf32, #tpu.memory_space<vmem>>, vector<1x32x128xf32>
    %227 = vector.shape_cast %226 : vector<1x32x128xf32> to vector<32x128xf32>
    %228 = vector.shape_cast %225 : vector<32x128xf32> to vector<1x32x128xf32>
    tpu.vector_store %arg14[%c0_134, %c0_135, %c0_136], %228 {strides = array<i32>} : memref<1x32x128xf32, #tpu.memory_space<vmem>>, vector<1x32x128xf32>,
    return
  }
  func.func @transform_0(%arg0: i32) -> (i32, i32, i32) {
    %c0_i32 = arith.constant 0 : i32
    %c0_i32_0 = arith.constant 0 : i32
    %c0_i32_1 = arith.constant 0 : i32
    return %arg0, %c0_i32, %c0_i32_0 : i32, i32, i32
  }
  func.func @transform_1(%arg0: i32) -> (i32, i32) {
    %c0_i32 = arith.constant 0 : i32
    %c0_i32_0 = arith.constant 0 : i32
    %c0_i32_1 = arith.constant 0 : i32
    return %c0_i32, %c0_i32_0 : i32, i32
  }
  func.func @transform_2(%arg0: i32) -> (i32, i32) {
    %c0_i32 = arith.constant 0 : i32
    %c0_i32_0 = arith.constant 0 : i32
    %c0_i32_1 = arith.constant 0 : i32
    return %c0_i32, %c0_i32_0 : i32, i32
  }
  func.func @transform_3(%arg0: i32) -> (i32, i32) {
    %c0_i32 = arith.constant 0 : i32
    %c0_i32_0 = arith.constant 0 : i32
    %c0_i32_1 = arith.constant 0 : i32
    return %c0_i32, %c0_i32_0 : i32, i32
  }
  func.func @transform_4(%arg0: i32) -> (i32, i32) {
    %c0_i32 = arith.constant 0 : i32
    %c0_i32_0 = arith.constant 0 : i32
    %c0_i32_1 = arith.constant 0 : i32
    return %c0_i32, %c0_i32_0 : i32, i32
  }
  func.func @transform_5(%arg0: i32) -> (i32, i32) {
    %c0_i32 = arith.constant 0 : i32
    %c0_i32_0 = arith.constant 0 : i32
    %c0_i32_1 = arith.constant 0 : i32
    return %c0_i32, %c0_i32_0 : i32, i32
  }
  func.func @transform_6(%arg0: i32) -> (i32, i32) {
    %c0_i32 = arith.constant 0 : i32
    %c0_i32_0 = arith.constant 0 : i32
    %c0_i32_1 = arith.constant 0 : i32
    return %c0_i32, %c0_i32_0 : i32, i32
  }
  func.func @transform_7(%arg0: i32) -> (i32, i32) {
    %c0_i32 = arith.constant 0 : i32
    %c0_i32_0 = arith.constant 0 : i32
    %c0_i32_1 = arith.constant 0 : i32
    return %c0_i32, %c0_i32_0 : i32, i32
  }
  func.func @transform_8(%arg0: i32) -> (i32, i32) {
    %c0_i32 = arith.constant 0 : i32
    %c0_i32_0 = arith.constant 0 : i32
    %c0_i32_1 = arith.constant 0 : i32
    return %c0_i32, %c0_i32_0 : i32, i32
  }
  func.func @transform_9(%arg0: i32) -> (i32, i32) {
    %c0_i32 = arith.constant 0 : i32
    %c0_i32_0 = arith.constant 0 : i32
    %c0_i32_1 = arith.constant 0 : i32
    return %c0_i32, %c0_i32_0 : i32, i32
  }
  func.func @transform_10(%arg0: i32) -> (i32, i32) {
    %c0_i32 = arith.constant 0 : i32
    %c0_i32_0 = arith.constant 0 : i32
    %c0_i32_1 = arith.constant 0 : i32
    return %c0_i32, %c0_i32_0 : i32, i32
  }
  func.func @transform_11(%arg0: i32) -> (i32, i32) {
    %c0_i32 = arith.constant 0 : i32
    %c0_i32_0 = arith.constant 0 : i32
    %c0_i32_1 = arith.constant 0 : i32
    return %c0_i32, %c0_i32_0 : i32, i32
  }
  func.func @transform_12(%arg0: i32) -> (i32, i32) {
    %c0_i32 = arith.constant 0 : i32
    %c0_i32_0 = arith.constant 0 : i32
    %c0_i32_1 = arith.constant 0 : i32
    return %c0_i32, %c0_i32_0 : i32, i32
  }
  func.func @transform_13(%arg0: i32) -> (i32, i32, i32) {
    %c0_i32 = arith.constant 0 : i32
    %c0_i32_0 = arith.constant 0 : i32
    %c0_i32_1 = arith.constant 0 : i32
    return %arg0, %c0_i32, %c0_i32_0 : i32, i32, i32
  }
}

</mosaic_0001>

<bundles_post_ra>
// kernel: encoder_block_forward.1
= control target key start
LH: loop header
LB: loop body
LE: loop exit
PB: predicated region body
PF: predicated region fallthrough
CT: control target
= control target key end

     0   :  { %s1965_s25 = smov 0   ;;  %s2364_s0 = inlined_call_operand.vmem [shape: bf16[2,4,128], index: 0, kind: input, shape index: {}]   ;;  %s2365_s1 = inlined_call_operand.vmem [shape: bf16[32,36], index: 1, kind: input, shape index: {}]   ;;  %s2366_s2 = inlined_call_operand.vmem [shape: f32[32,1], index: 2, kind: input, shape index: {}]   ;;  %s2367_s3 = inlined_call_operand.vmem [shape: f32[32,1], index: 3, kind: input, shape index: {}]   ;;  %s2368_s4 = inlined_call_operand.vmem [shape: f32[32,1], index: 4, kind: input, shape index: {}]   ;;  %s2369_s5 = inlined_call_operand.vmem [shape: bf16[32,288], index: 5, kind: input, shape index: {}]   ;;  %s2370_s6 = inlined_call_operand.vmem [shape: f32[32,1], index: 6, kind: input, shape index: {}]   ;;  %s2371_s7 = inlined_call_operand.vmem [shape: f32[32,1], index: 7, kind: input, shape index: {}]   ;;  %s2372_s8 = inlined_call_operand.vmem [shape: f32[32,1], index: 8, kind: input, shape index: {}]   ;;  %s2373_s9 = inlined_call_operand.vmem [shape: f32[32,32], index: 9, kind: input, shape index: {}]   ;;  %s2374_s10 = inlined_call_operand.vmem [shape: bf16[1,128], index: 10, kind: input, shape index: {}]   ;;  %s2375_s11 = inlined_call_operand.vmem [shape: bf16[1,128], index: 11, kind: input, shape index: {}]   ;;  %s2376_s12 = inlined_call_operand.vmem [shape: f32[1,128], index: 12, kind: input, shape index: {}]   ;;  %s2377_s13 = inlined_call_operand.vmem [shape: f32[2,32,128], index: 13, kind: output, shape index: {}]  }
   0x1 LB: > { %s1700_s9 = sadd.s32 4294967295, %s1883_s25   ;;  %p1704_p0 = scmp.ge.s32.totalorder %s1883_s25, 1  ;;  %s1883_s25 = sphi %s1965_s25, %s23_s25  }
   0x2   : > { %p386_p1 = scmp.lt.s32.totalorder %s1883_s25, 3 }
   0x4   : > { %p387_p2 = pnand %p1704_p0, %p386_p1 }
   0x5   : > { %v439_v0 = vld [vmem:[%s2374_s10] sm:$0x1] (!%p387_p2)  ;;  %v450_v1 = vlaneseq (!%p387_p2)  ;;  %v1885_v2 = vmov (!%p387_p2), 1983009808   ;;  %v1886_v8 = vmov (!%p387_p2), 0   ;;  %p429_p3 = scmp.lt.s32.totalorder (!%p387_p2), %s1700_s9, 1 }
   0x6   : > { %390 = sbr.rel (%p387_p2) target bundleno = 1349 (0x545), region = 72  ;;  %v456_v3 = vunpack.c.l.s4 (!%p387_p2), %v1885_v2  ;;  %v440_v4 = vld [vmem:[%s2375_s11] sm:$0x1] (!%p387_p2)  ;;  %v448_v5 = vpack.i.b16 (!%p387_p2), %v439_v0, %v439_v0  ;;  %443 = vst [vmem:[#allocation2] sm:$0x3] (!%p387_p2), %v1886_v8  ;;  %1802 = vset.pattern.permute.xlu1 (!%p387_p2), %v1886_v8  ;;  %1801 = vset.pattern.permute.xlu0 (!%p387_p2), %v1886_v8  ;;  %s1887_s17 = smov (!%p387_p2), 127  }
   0x7   : > { %v451_v6 = vshrl.u32 (!%p387_p2), %v450_v1, 7  ;;  %v503_v7 = vpack.i.b16 (!%p387_p2), %v440_v4, %v440_v4  ;;  %444 = vst [vmem:[#allocation2 + $0x4] sm:$0x3] (!%p387_p2), %v1886_v8  ;;  %s1888_s18 = smov (!%p387_p2), 121   ;;  %s1889_s19 = smov (!%p387_p2), 119   ;;  %vm543_vm0 = vcmask (!%p387_p2), 1039360  }
   0x8   : > { %v457_v9 = vunpack.c.0.s8 (!%p387_p2), %v456_v3  ;;  %s1890_s20 = smov (!%p387_p2), 1   ;;  %s1891_s21 = smov (!%p387_p2), 7   ;;  %vm520_vm1 = vcmask (!%p387_p2), 990208   ;;  %vm465_vm2 = vcmask (!%p387_p2), 973824   ;;  %vm559_vm3 = vcmask (!%p387_p2), 7168   ;;  %v1818_v63 = vld [vmem:[%s2365_s1] sm:$0xff] (!%p387_p2)  }
   0x9   : > { %v452_v10 = vsub.s32 (!%p387_p2), 0, %v451_v6  ;;  %s1892_s22 = smov (!%p387_p2), 9   ;;  %s2380_s23 = smov (!%p387_p2), 8   ;;  %vm535_vm4 = vcmask (!%p387_p2), 56320   ;;  %vm480_vm5 = vcmask (!%p387_p2), 72704   ;;  %vm497_vm6 = vcmask (!%p387_p2), 64512  }
   0xa   : > { %v1983_v11 = vsub.s32 (!%p387_p2), %v457_v9, %v451_v6  ;;  %s2378_s24 = smov (!%p387_p2), 120   ;;  %vm704_vm7 = vcmask (!%p387_p2), 293888   ;;  %v656_v0 = vld [vmem:[%s2366_s2 + $0x8] sm:$0xff] (!%p387_p2)  ;;  %v655_v1 = vld [vmem:[%s2366_s2] sm:$0xff] (!%p387_p2)  ;;  %v657_v2 = vld [vmem:[%s2366_s2 + $0x10] sm:$0xff] (!%p387_p2)  ;;  %vm621_vm8 = vcmask (!%p387_p2), 982016  }
   0xb   : > { %v1987_v12 = vrot.slane (!%p387_p2), %v448_v5, %v452_v10  ;;  %v1989_v13 = vrot.slane (!%p387_p2), %v503_v7, %v452_v10  ;;  %1770 = vmatprep.mubr.msk.bf16.mxu0 (!%p387_p2), %vm704_vm7, %v1818_v63  ;;  %v658_v3 = vld [vmem:[%s2366_s2 + $0x18] sm:$0xff] (!%p387_p2)  ;;  %v831_v4 = vld [vmem:[%s2367_s3 + $0x8] sm:$0xff] (!%p387_p2)  ;;  %v830_v5 = vld [vmem:[%s2367_s3] sm:$0xff] (!%p387_p2)  ;;  %vm711_vm9 = vcmask (!%p387_p2), 1041408   ;;  %vm1308_vm14 = vcmask (!%p387_p2), 261120  }
   0xc   : > { %v858_v6 = vld [vmem:[%s2368_s4] sm:$0xff] (!%p387_p2)  ;;  %v859_v7 = vld [vmem:[%s2368_s4 + $0x8] sm:$0xff] (!%p387_p2)  ;;  %v832_v9 = vld [vmem:[%s2367_s3 + $0x10] sm:$0xff] (!%p387_p2) }
   0xd   : > { %s2385_s9 = smov (!%p429_p3, %s1700_s9), 1  ;;  %v461_v14 = vrot.slane %v1987_v12, %v1983_v11  ;;  %v516_v15 = vrot.slane %v1989_v13, %v1983_v11  ;;  %v1813_v17 = vld [vmem:[#allocation2] ss:$0 sps:$4 sm:$0xff]  }
   0xe   : > { %s1705_s30 = sshll.u32 %s2385_s9, 1  ;;  %v493_v18 = vrot.slane %v1813_v17, %v1983_v11  ;;  %s1726_s28 = sshll.u32 %s2385_s9, 5 }
   0xf   : > { %s432_s16 = scalar_lea.vmem %s2364_s0, %s1705_s30  ;;  %540 = vrot.lane.b32.xlu0 %v461_v14, %s1887_s17  ;;  %517 = vrot.lane.b32.xlu1 %v516_v15, %s1888_s18  ;;  %s437_s14 = scalar_lea.vmem %s2377_s13, %s1726_s28 }
  0x10   : > { %v442_v16 = vld [vmem:[%s432_s16] sm:$0x3] }
  0x11   : > { %445 = vst [vmem:[#allocation2 + $0x2] sm:$0x3] %v442_v16 }
  0x13   : > { %462 = vrot.lane.b32.xlu0 %v461_v14, %s1889_s19  ;;  %566 = vrot.lane.b32.xlu1 %v516_v15, %s1890_s20 }
  0x17   : > { %588 = vrot.lane.b32.xlu0 %v461_v14, %s1891_s21  ;;  %626 = vrot.lane.b32.xlu1 %v516_v15, %s1892_s22 }
  0x18   : > { %v539_v21 = vld [vmem:[#allocation2] sm:$0xf] }
  0x19   : > { %v446_v28 = vld [vmem:[#allocation2] sm:$0xf] }
  0x1a   : > { %v501_v32 = vld [vmem:[#allocation2] sm:$0xf] }
  0x1b   : > { %494 = vrot.lane.b32.xlu1 %v493_v18, %s2380_s23  ;;  %v565_v35 = vld [vmem:[#allocation2 + $0x2] sm:$0xf]  ;;  %s2382_s23 = smov 8  }
  0x1c   : > { %v587_v40 = vld [vmem:[#allocation2 + $0x2] sm:$0xf] }
  0x1d   : > { %v625_v43 = vld [vmem:[#allocation2 + $0x2] sm:$0xf] }
  0x1e   : > { %v563_v45 = vld [vmem:[#allocation2 + $0x2] sm:$0x3] }
  0x1f   : > { %564 = vst [vmem:[#allocation3 + $0x8] sm:$0x3] %v563_v45  ;;  %v1814_v60 = vld [vmem:[#allocation2 + $0x2] ss:$0 sps:$4 sm:$0xff]  }
  0x20   : > { %v617_v62 = vrot.slane %v1814_v60, %v1983_v11  ;;  %v833_v60 = vld [vmem:[%s2367_s3 + $0x18] sm:$0xff] }
  0x81   : > { %v541_v19 = vpop.permute.xlu0 %540  ;;  %v518_v20 = vpop.permute.xlu1 %517 }
  0x82   : > { %v542_v22 = vrot.slane %v541_v19, 6  ;;  %v519_v24 = vrot.slane %v518_v20, 6 }
  0x84   : > { %v544_v23 = vsel %vm543_vm0, %v542_v22, %v541_v19  ;;  %v521_v33 = vsel %vm520_vm1, %v519_v24, %v518_v20 }
  0x85   : > { %v546_v25 = vmul.bf16 %v544_v23, %v539_v21  ;;  %v463_v26 = vpop.permute.xlu0 %462  ;;  %v567_v27 = vpop.permute.xlu1 %566  ;;  %v523_v46 = vmul.bf16 %v521_v33, %v501_v32 }
  0x86   : > { %v464_v29 = vrot.slane %v463_v26, 6  ;;  %v568_v30 = vrot.slane %v567_v27, 6 }
  0x87   : > { %v548_v31 = vcombine.low %v546_v25, %v546_v25  ;;  %v531_v56 = vrot.slane %v523_v46, %v1983_v11 }
  0x88   : > { %v466_v34 = vsel %vm465_vm2, %v464_v29, %v463_v26  ;;  %v569_v36 = vsel %vm559_vm3, %v568_v30, %v567_v27 }
  0x89   : > { %v468_v37 = vmul.bf16 %v466_v34, %v446_v28  ;;  %v555_v38 = vrot.slane %v548_v31, %v1983_v11  ;;  %v589_v39 = vpop.permute.xlu0 %588  ;;  %v627_v41 = vpop.permute.xlu1 %626  ;;  %v571_v47 = vmul.bf16 %v569_v36, %v565_v35 }
  0x8a   : > { %v590_v42 = vrot.slane %v589_v39, 6  ;;  %v628_v44 = vrot.slane %v627_v41, 6 }
  0x8b   : > { %556 = vrot.lane.b32.xlu1 %v555_v38, %s1890_s20  ;;  %v476_v48 = vrot.slane %v468_v37, %v1983_v11  ;;  %v573_v55 = vcombine.low %v571_v47, %v571_v47  ;;  %v1819_v37 = vld [vmem:[%s2365_s1 + $0x8] sm:$0xff]  }
  0x8c   : > { %v591_v49 = vsel %vm535_vm4, %v590_v42, %v589_v39  ;;  %v629_v50 = vsel %vm480_vm5, %v628_v44, %v627_v41  ;;  %v2073_v41 = vld [vmem:[%s2376_s12] ss:$0 sm:$0xff] }
  0x8d   : > { %v593_v51 = vmul.bf16 %v591_v49, %v587_v40  ;;  %477 = vrot.lane.b32.xlu0 %v476_v48, %s1892_s22  ;;  %v631_v52 = vmul.bf16 %v629_v50, %v625_v43  ;;  %v495_v53 = vpop.permute.xlu1 %494  ;;  %v580_v61 = vrot.slane %v573_v55, %v1983_v11 }
  0x8e   : > { %v496_v54 = vrot.slane %v495_v53, 4 }
  0x8f   : > { %v601_v57 = vrot.slane %v593_v51, %v1983_v11  ;;  %v639_v59 = vrot.slane %v631_v52, %v1983_v11 }
  0x90   : > { %v498_v58 = vsel %vm497_vm6, %v495_v53, %v496_v54 }
  0x91   : > { %532 = vrot.lane.b32.xlu0 %v531_v56, %s1891_s21  ;;  %602 = vrot.lane.b32.xlu1 %v601_v57, %s1888_s18  ;;  %500 = vst [vmem:[#allocation3] sm:$0xc] %v498_v58 }
  0x95   : > { %581 = vrot.lane.b32.xlu0 %v580_v61, %s1887_s17  ;;  %640 = vrot.lane.b32.xlu1 %v639_v59, %s1889_s19  ;;  %v860_v59 = vld [vmem:[%s2368_s4 + $0x10] sm:$0xff]  ;;  %v861_v61 = vld [vmem:[%s2368_s4 + $0x18] sm:$0xff] }
  0x99   : > { %618 = vrot.lane.b32.xlu0 %v617_v62, %s2378_s24  ;;  %666 = vperm.xlu1 %1802, %v656_v0  }
  0x9d   : > { %661 = vperm.xlu0 %1801, %v655_v1   ;;  %671 = vperm.xlu1 %1802, %v657_v2  }
  0xa1   : > { %676 = vperm.xlu0 %1801, %v658_v3   ;;  %841 = vperm.xlu1 %1802, %v831_v4  }
  0xa5   : > { %836 = vperm.xlu0 %1801, %v830_v5   ;;  %864 = vperm.xlu1 %1802, %v858_v6  }
  0xa9   : > { %869 = vperm.xlu0 %1801, %v859_v7   ;;  %846 = vperm.xlu1 %1802, %v832_v9  }
  0xfd   : > { %v557_v10 = vpop.permute.xlu1 %556 }
  0xfe   : > { %v558_v11 = vrot.slane %v557_v10, 4 }
  0xff   : > { %v478_v14 = vpop.permute.xlu0 %477 }
 0x100   : > { %v560_v15 = vsel %vm559_vm3, %v557_v10, %v558_v11  ;;  %v479_v16 = vrot.slane %v478_v14, 4 }
 0x101   : > { %562 = vst [vmem:[#allocation3 + $0x4] sm:$0xc] %v560_v15 }
 0x102   : > { %v481_v17 = vsel %vm480_vm5, %v478_v14, %v479_v16 }
 0x103   : > { %483 = vst [vmem:[#allocation3] sm:$0x3] %v481_v17  ;;  %v533_v18 = vpop.permute.xlu0 %532  ;;  %v603_v19 = vpop.permute.xlu1 %602 }
 0x104   : > { %v534_v20 = vrot.slane %v533_v18, 4  ;;  %v604_v21 = vrot.slane %v603_v19, 4 }
 0x106   : > { %v536_v22 = vsel %vm535_vm4, %v533_v18, %v534_v20  ;;  %v605_v23 = vsel %vm520_vm1, %v603_v19, %v604_v21 }
 0x107   : > { %538 = vst [vmem:[#allocation3 + $0x4] sm:$0x3] %v536_v22  ;;  %607 = vst [vmem:[#allocation3 + $0xc] sm:$0x3] %v605_v23  ;;  %v582_v24 = vpop.permute.xlu0 %581  ;;  %v641_v25 = vpop.permute.xlu1 %640 }
 0x108   : > { %v583_v26 = vrot.slane %v582_v24, 4  ;;  %v642_v27 = vrot.slane %v641_v25, 4 }
 0x10a   : > { %v584_v28 = vsel %vm543_vm0, %v582_v24, %v583_v26  ;;  %v643_v29 = vsel %vm465_vm2, %v641_v25, %v642_v27 }
 0x10b   : > { %586 = vst [vmem:[#allocation3 + $0x8] sm:$0xc] %v584_v28  ;;  %645 = vst [vmem:[#allocation3 + $0x10] sm:$0x3] %v643_v29  ;;  %v619_v30 = vpop.permute.xlu0 %618 }
 0x10c   : > { %v620_v31 = vrot.slane %v619_v30, 4 }
 0x10e   : > { %v622_v32 = vsel %vm621_vm8, %v619_v30, %v620_v31  ;;  %v1815_v33 = vld [vmem:[#allocation3] sm:$0xff]  }
 0x10f   : > { %624 = vst [vmem:[#allocation3 + $0xc] sm:$0xc] %v622_v32  ;;  %1764 = vmatprep.subr.bf16.mxu0 %v1815_v33 }
 0x110   : > { %1765 = vmatpush3.bf16.msra.mxu0 %v1815_v33 }
 0x112   : > { %v1817_v35 = vld [vmem:[#allocation3 + $0x10] ss:$0 sps:$4 sm:$0x33]  }
 0x113   : > { %v713_v36 = vsel %vm711_vm9, %v1817_v35, 0 }
 0x116   : > { %v1816_v34 = vld [vmem:[#allocation3 + $0x8] sm:$0xff]  }
 0x117   : > { %1766 = vmatprep.subr.bf16.mxu0 %v1816_v34 }
 0x118   : > { %1767 = vmatpush3.bf16.msra.mxu0 %v1816_v34  ;;  %v667_v38 = vpop.permute.xlu1 %666 }
 0x119   : > { %1782 = vmatprep.subr.msk.bf16.mxu0 %vm711_vm9, %v1817_v35 }
 0x11c   : > { %1769 = vmatpush3.bf16.msra.mxu0 %v713_v36  ;;  %v662_v39 = vpop.permute.xlu0 %661  ;;  %v672_v40 = vpop.permute.xlu1 %671 }
 0x11f   : > { %1771 = vmatmul.mubr.msk.bf16.vlgmr.msra.gmra.mrb[0].mxu0 %vm704_vm7, %v1819_v37 }
 0x120   : > { %v677_v47 = vpop.permute.xlu0 %676  ;;  %v2120_v62 = vpop.permute.xlu1 %841 }
 0x124   : > { %v2122_v63 = vpop.permute.xlu0 %836  ;;  %v2124_v0 = vpop.permute.xlu1 %864 }
 0x128   : > { %v2126_v1 = vpop.permute.xlu0 %869  ;;  %v847_v2 = vpop.permute.xlu1 %846 }
 0x1f2   : > { %v1772_v42 = vpop.f32.mrb[0].mxu0 }
 0x1f3   : > { %v758_v43 = vadd.f32 %v1772_v42, %v672_v40  ;;  %v749_v44 = vpop.f32.mrb[1].mxu0 }
 0x1f4   : > { %v750_v45 = vadd.f32 %v749_v44, %v662_v39  ;;  %v1773_v46 = vpop.f32.mrb[2].mxu0 }
 0x1f5   : > { %v2076_v48 = vmul.f32 %v2073_v41, %v758_v43  ;;  %v752_v49 = vpop.f32.mrb[3].mxu0  ;;  %v761_v51 = vadd.f32 %v1773_v46, %v677_v47 }
 0x1f6   : > { %v2079_v50 = vmul.f32 %v2073_v41, %v750_v45  ;;  %v753_v52 = vadd.f32 %v752_v49, %v667_v38 }
 0x1f7   : > { %778 = vadd.xlane.f32.xlu0 %v2076_v48  ;;  %v784_v53 = vmul.f32 %v2076_v48, %v2076_v48  ;;  %v2086_v54 = vmul.f32 %v2073_v41, %v761_v51 }
 0x1f8   : > { %774 = vadd.xlane.f32.xlu1 %v2079_v50  ;;  %v2090_v55 = vmul.f32 %v2073_v41, %v753_v52  ;;  %v782_v57 = vmul.f32 %v2079_v50, %v2079_v50 }
 0x1f9   : > { %v785_v56 = vmul.f32 %v2086_v54, %v2086_v54 }
 0x1fa   : > { %v783_v58 = vmul.f32 %v2090_v55, %v2090_v55 }
 0x1fb   : > { %790 = vadd.xlane.f32.xlu0 %v784_v53 }
 0x1fc   : > { %780 = vadd.xlane.f32.xlu1 %v2086_v54 }
 0x1ff   : > { %776 = vadd.xlane.f32.xlu0 %v2090_v55 }
 0x200   : > { %792 = vadd.xlane.f32.xlu1 %v785_v56 }
 0x203   : > { %786 = vadd.xlane.f32.xlu0 %v782_v57 }
 0x204   : > { %788 = vadd.xlane.f32.xlu1 %v783_v58 }
 0x215   : > { %874 = vperm.xlu1 %1802, %v860_v59  }
 0x219   : > { %851 = vperm.xlu0 %1801, %v833_v60   ;;  %1010 = vrot.lane.b32.xlu1 %v1987_v12, %s1889_s19 }
 0x21d   : > { %879 = vperm.xlu0 %1801, %v861_v61   ;;  %1152 = vrot.lane.b32.xlu1 %v1987_v12, %s1891_s21 }
 0x221   : > { %1123 = vrot.lane.b32.xlu0 %v1989_v13, %s1890_s20  ;;  %1090 = vrot.lane.b32.xlu1 %v1987_v12, %s1887_s17 }
 0x225   : > { %1061 = vrot.lane.b32.xlu0 %v1989_v13, %s1888_s18 }
 0x229   : > { %1203 = vrot.lane.b32.xlu0 %v1989_v13, %s1892_s22 }
 0x284   : > { %v779_v3 = vpop.xlane.xlu0 %778 }
 0x285   : > { %v796_v4 = vmul.f32 0.015625, %v779_v3  ;;  %v775_v5 = vpop.xlane.xlu1 %774 }
 0x286   : > { %v794_v13 = vmul.f32 0.015625, %v775_v5 }
 0x287   : > { %v804_v12 = vmul.f32 %v796_v4, %v796_v4  ;;  %v816_v39 = vsub.f32 %v2076_v48, %v796_v4 }
 0x288   : > { %v791_v6 = vpop.xlane.xlu0 %790  ;;  %v802_v23 = vmul.f32 %v794_v13, %v794_v13  ;;  %v814_v56 = vsub.f32 %v2079_v50, %v794_v13 }
 0x289   : > { %v800_v7 = vmul.f32 0.015625, %v791_v6  ;;  %v781_v9 = vpop.xlane.xlu1 %780 }
 0x28a   : > { %v797_v10 = vmul.f32 0.015625, %v781_v9 }
 0x28b   : > { %v808_v11 = vsub.f32 %v800_v7, %v804_v12 }
 0x28c   : > { %v777_v14 = vpop.xlane.xlu0 %776  ;;  %v805_v17 = vmul.f32 %v797_v10, %v797_v10  ;;  %v817_v46 = vsub.f32 %v2086_v54, %v797_v10 }
 0x28d   : > { %v812_v15 = vmax.f32 %v808_v11, 0.0  ;;  %v793_v16 = vpop.xlane.xlu1 %792  ;;  %v795_v18 = vmul.f32 0.015625, %v777_v14 }
 0x28e   : > { %v801_v19 = vmul.f32 0.015625, %v793_v16 }
 0x28f   : > { %v820_v20 = vadd.f32 1e-05, %v812_v15  ;;  %v803_v26 = vmul.f32 %v795_v18, %v795_v18  ;;  %v815_v59 = vsub.f32 %v2090_v55, %v795_v18 }
 0x290   : > { %v809_v21 = vsub.f32 %v801_v19, %v805_v17  ;;  %v787_v22 = vpop.xlane.xlu0 %786 }
 0x291   : > { %1828 = vrsqrt.f32 %v820_v20  ;;  %v798_v24 = vmul.f32 0.015625, %v787_v22  ;;  %v789_v25 = vpop.xlane.xlu1 %788 }
 0x292   : > { %v813_v27 = vmax.f32 %v809_v21, 0.0  ;;  %v799_v28 = vmul.f32 0.015625, %v789_v25 }
 0x293   : > { %v806_v29 = vsub.f32 %v798_v24, %v802_v23 }
 0x294   : > { %v821_v30 = vadd.f32 1e-05, %v813_v27  ;;  %v807_v31 = vsub.f32 %v799_v28, %v803_v26 }
 0x295   : > { %v810_v32 = vmax.f32 %v806_v29, 0.0  ;;  %v875_v33 = vpop.permute.xlu1 %874 }
 0x296   : > { %1830 = vrsqrt.f32 %v821_v30  ;;  %v811_v34 = vmax.f32 %v807_v31, 0.0 }
 0x297   : > { %v818_v35 = vadd.f32 1e-05, %v810_v32 }
 0x298   : > { %v819_v36 = vadd.f32 1e-05, %v811_v34  ;;  %v852_v37 = vpop.permute.xlu0 %851 }
 0x299   : > { %1832 = vrsqrt.f32 %v818_v35  ;;  %v2128_v38 = vpop.permute.xlu1 %1010 }
 0x29a   : > { %1834 = vrsqrt.f32 %v819_v36  ;;  %v1013_v40 = vmul.bf16 0, %v2128_v38 }
 0x29b   : > { %v1829_v42 = vpop.eup %1828 }
 0x29c   : > { %v828_v43 = vmul.f32 %v1829_v42, %v816_v39  ;;  %v880_v44 = vpop.permute.xlu0 %879  ;;  %1021 = vrot.lane.b32.xlu1 %v1013_v40, %s1892_s22 }
 0x29d   : > { %v2140_v53 = vpop.permute.xlu1 %1152 }
 0x29e   : > { %v856_v45 = vmul.f32 %v847_v2, %v828_v43  ;;  %v1156_v3 = vmul.bf16 0, %v2140_v53 }
 0x2a0   : > { %v1831_v47 = vpop.eup %1830  ;;  %v2134_v49 = vadd.f32 %v875_v33, %v856_v45  ;;  %v2136_v51 = vpop.permute.xlu0 %1123  ;;  %1025 = vrot.lane.b32.xlu1 %v1013_v40, %s1892_s22 }
 0x2a1   : > { %v829_v52 = vmul.f32 %v1831_v47, %v817_v46  ;;  %v1127_v48 = vmul.bf16 0, %v2136_v51 }
 0x2a2   : > { %v888_v57 = vand.u32 2147483647, %v2134_v49  ;;  %vm972_vm10 = vcmp.ge.f32.partialorder %v2134_v49, 0.0 }
 0x2a3   : > { %v1833_v58 = vpop.eup %1832  ;;  %v857_v54 = vmul.f32 %v852_v37, %v829_v52  ;;  %1136 = vrot.lane.b32.xlu0 %v1127_v48, %s1887_s17 }
 0x2a4   : > { %v1835_v60 = vpop.eup %1834  ;;  %v826_v61 = vmul.f32 %v1833_v58, %v814_v56  ;;  %v892_v2 = vmul.f32 0.70710677, %v888_v57  ;;  %1804 = vrot.lane.b32.xlu1 %v1886_v8, %s2382_s23  ;;  %v2152_v12 = vpop.permute.xlu0 %1061 }
 0x2a5   : > { %v827_v4 = vmul.f32 %v1835_v60, %v815_v59  ;;  %v2149_v5 = vadd.f32 %v880_v44, %v857_v54  ;;  %v1064_v9 = vmul.bf16 0, %v2152_v12 }
 0x2a6   : > { %v854_v50 = vmul.f32 %v2122_v63, %v826_v61  ;;  %v896_v6 = vmul.f32 0.3275911, %v892_v2  ;;  %v948_v21 = vsub.f32 0.0, %v892_v2 }
 0x2a7   : > { %v855_v55 = vmul.f32 %v2120_v62, %v827_v4  ;;  %v889_v7 = vand.u32 2147483647, %v2149_v5  ;;  %1140 = vrot.lane.b32.xlu0 %v1127_v48, %s1887_s17  ;;  %vm973_vm11 = vcmp.ge.f32.partialorder %v2149_v5, 0.0 }
 0x2a8   : > { %v2159_v10 = vadd.f32 %v2124_v0, %v854_v50  ;;  %v900_v11 = vadd.f32 1.0, %v896_v6  ;;  %1165 = vrot.lane.b32.xlu1 %v1156_v3, %s1888_s18  ;;  %v952_v23 = vmul.f32 %v948_v21, %v892_v2 }
 0x2a9   : > { %v2165_v63 = vadd.f32 %v2126_v1, %v855_v55  ;;  %v893_v14 = vmul.f32 0.70710677, %v889_v7 }
 0x2aa   : > { %v886_v62 = vand.u32 2147483647, %v2159_v10  ;;  %1836 = vrcp.f32 %v900_v11  ;;  %v958_v28 = vmul.f32 1.442695, %v952_v23  ;;  %vm970_vm12 = vcmp.ge.f32.partialorder %v2159_v10, 0.0 }
 0x2ab   : > { %v887_v13 = vand.u32 2147483647, %v2165_v63  ;;  %1072 = vrot.lane.b32.xlu0 %v1064_v9, %s1891_s21  ;;  %v897_v15 = vmul.f32 0.3275911, %v893_v14  ;;  %v949_v25 = vsub.f32 0.0, %v893_v14  ;;  %vm971_vm13 = vcmp.ge.f32.partialorder %v2165_v63, 0.0 }
 0x2ac   : > { %v890_v0 = vmul.f32 0.70710677, %v886_v62 }
 0x2ad   : > { %v891_v16 = vmul.f32 0.70710677, %v887_v13  ;;  %v901_v18 = vadd.f32 1.0, %v897_v15  ;;  %v953_v32 = vmul.f32 %v949_v25, %v893_v14 }
 0x2ae   : > { %v894_v17 = vmul.f32 0.3275911, %v890_v0  ;;  %v946_v27 = vsub.f32 0.0, %v890_v0 }
 0x2af   : > { %v895_v19 = vmul.f32 0.3275911, %v891_v16  ;;  %1838 = vrcp.f32 %v901_v18  ;;  %v947_v29 = vsub.f32 0.0, %v891_v16  ;;  %v960_v45 = vmul.f32 1.442695, %v953_v32 }
 0x2b0   : > { %v898_v20 = vadd.f32 1.0, %v894_v17  ;;  %v950_v36 = vmul.f32 %v946_v27, %v890_v0 }
 0x2b1   : > { %v899_v1 = vadd.f32 1.0, %v895_v19  ;;  %v951_v40 = vmul.f32 %v947_v29, %v891_v16 }
 0x2b2   : > { %1840 = vrcp.f32 %v898_v20  ;;  %v954_v48 = vmul.f32 1.442695, %v950_v36 }
 0x2b3   : > { %1842 = vrcp.f32 %v899_v1  ;;  %v956_v58 = vmul.f32 1.442695, %v951_v40 }
 0x2b4   : > { %v1837_v22 = vpop.eup %1836  ;;  %1844 = vpow2.f32 %v958_v28 }
 0x2b5   : > { %v912_v24 = vmul.f32 1.0614054, %v1837_v22  ;;  %1846 = vpow2.f32 %v960_v45 }
 0x2b6   : > { %1848 = vpow2.f32 %v954_v48 }
 0x2b7   : > { %v916_v26 = vadd.f32 -1.4531521, %v912_v24  ;;  %1850 = vpow2.f32 %v956_v58 }
 0x2b9   : > { %v920_v30 = vmul.f32 %v1837_v22, %v916_v26  ;;  %v1839_v31 = vpop.eup %1838 }
 0x2ba   : > { %v913_v34 = vmul.f32 1.0614054, %v1839_v31 }
 0x2bb   : > { %v924_v33 = vadd.f32 1.4214138, %v920_v30 }
 0x2bc   : > { %v1841_v35 = vpop.eup %1840  ;;  %v917_v43 = vadd.f32 -1.4531521, %v913_v34 }
 0x2bd   : > { %v1843_v37 = vpop.eup %1842  ;;  %v910_v39 = vmul.f32 1.0614054, %v1841_v35  ;;  %v928_v42 = vmul.f32 %v1837_v22, %v924_v33 }
 0x2be   : > { %v911_v44 = vmul.f32 1.0614054, %v1843_v37  ;;  %v921_v52 = vmul.f32 %v1839_v31, %v917_v43  ;;  %v1845_v11 = vpop.eup %1844 }
 0x2bf   : > { %v914_v46 = vadd.f32 -1.4531521, %v910_v39  ;;  %v932_v47 = vadd.f32 -0.28449672, %v928_v42  ;;  %v1847_v23 = vpop.eup %1846  ;;  %v984_v42 = vmul.f32 0.5, %v2134_v49  ;;  %v983_v49 = vmul.f32 0.5, %v2165_v63 }
 0x2c0   : > { %v915_v56 = vadd.f32 -1.4531521, %v911_v44  ;;  %v925_v54 = vadd.f32 1.4214138, %v921_v52  ;;  %v1849_v27 = vpop.eup %1848 }
 0x2c1   : > { %v918_v57 = vmul.f32 %v1841_v35, %v914_v46  ;;  %v936_v59 = vmul.f32 %v1837_v22, %v932_v47  ;;  %v1851_v29 = vpop.eup %1850  ;;  %v982_v47 = vmul.f32 0.5, %v2159_v10 }
 0x2c2   : > { %v919_v60 = vmul.f32 %v1843_v37, %v915_v56  ;;  %v929_v4 = vmul.f32 %v1839_v31, %v925_v54 }
 0x2c3   : > { %v922_v61 = vadd.f32 1.4214138, %v918_v57  ;;  %v940_v2 = vadd.f32 0.2548296, %v936_v59 }
 0x2c4   : > { %v923_v50 = vadd.f32 1.4214138, %v919_v60  ;;  %v933_v7 = vadd.f32 -0.28449672, %v929_v4 }
 0x2c5   : > { %v926_v6 = vmul.f32 %v1841_v35, %v922_v61  ;;  %v944_v55 = vmul.f32 %v1837_v22, %v940_v2 }
 0x2c6   : > { %v927_v14 = vmul.f32 %v1843_v37, %v923_v50  ;;  %v937_v0 = vmul.f32 %v1839_v31, %v933_v7 }
 0x2c7   : > { %v930_v62 = vadd.f32 -0.28449672, %v926_v6  ;;  %v964_v13 = vmul.f32 %v1845_v11, %v944_v55 }
 0x2c8   : > { %v931_v15 = vadd.f32 -0.28449672, %v927_v14  ;;  %v941_v18 = vadd.f32 0.2548296, %v937_v0 }
 0x2c9   : > { %v934_v16 = vmul.f32 %v1841_v35, %v930_v62  ;;  %v968_v17 = vsub.f32 1.0, %v964_v13  ;;  %v1822_v62 = vld [vmem:[%s2369_s5 + $0x4] ss:$12 sps:$4 sm:$0xff]   ;;  %v1826_v13 = vld [vmem:[%s2369_s5 + $0x8] ss:$12 sps:$4 sm:$0xff]  }
 0x2ca   : > { %v935_v19 = vmul.f32 %v1843_v37, %v931_v15  ;;  %v945_v1 = vmul.f32 %v1839_v31, %v941_v18  ;;  %1347 = vmatprep.mubr.bf16.mxu1 %v1822_v62  ;;  %v1254_v15 = vld [vmem:[%s2370_s6] sm:$0xff]  ;;  %1778 = vmatprep.mubr.msk.bf16.mxu0 %vm1308_vm14, %v1826_v13  ;;  %v1255_v18 = vld [vmem:[%s2370_s6 + $0x8] sm:$0xff] }
 0x2cb   : > { %v938_v20 = vadd.f32 0.2548296, %v934_v16  ;;  %v976_v21 = vsub.f32 0.0, %v968_v17  ;;  %v1256_v16 = vld [vmem:[%s2370_s6 + $0x10] sm:$0xff]  ;;  %v1823_v62 = vld [vmem:[%s2369_s5 + $0x1c] ss:$12 sps:$4 sm:$0xff]  }
 0x2cc   : > { %v939_v24 = vadd.f32 0.2548296, %v935_v19  ;;  %v965_v26 = vmul.f32 %v1847_v23, %v945_v1  ;;  %v1475_v19 = vld [vmem:[%s2371_s7 + $0x10] sm:$0xff]  ;;  %v1473_v1 = vld [vmem:[%s2371_s7] sm:$0xff]  ;;  %v1476_v23 = vld [vmem:[%s2371_s7 + $0x18] sm:$0xff] }
 0x2cd   : > { %v942_v25 = vmul.f32 %v1841_v35, %v938_v20  ;;  %v980_v22 = vsel %vm972_vm10, %v968_v17, %v976_v21  ;;  %v985_v35 = vmul.f32 0.5, %v2149_v5  ;;  %v1474_v17 = vld [vmem:[%s2371_s7 + $0x8] sm:$0xff]  ;;  %v1257_v20 = vld [vmem:[%s2370_s6 + $0x18] sm:$0xff]  ;;  %v1501_v21 = vld [vmem:[%s2372_s8] sm:$0xff] }
 0x2ce   : > { %v943_v28 = vmul.f32 %v1843_v37, %v939_v24  ;;  %v969_v32 = vsub.f32 1.0, %v965_v26  ;;  %v988_v34 = vadd.f32 1.0, %v980_v22  ;;  %v1502_v24 = vld [vmem:[%s2372_s8 + $0x8] sm:$0xff] }
 0x2cf   : > { %v962_v30 = vmul.f32 %v1849_v27, %v942_v25 }
 0x2d0   : > { %v963_v33 = vmul.f32 %v1851_v29, %v943_v28  ;;  %v977_v39 = vsub.f32 0.0, %v969_v32  ;;  %v992_v37 = vmul.f32 %v988_v34, %v984_v42 }
 0x2d1   : > { %v966_v36 = vsub.f32 1.0, %v962_v30 }
 0x2d2   : > { %v967_v40 = vsub.f32 1.0, %v963_v33  ;;  %v981_v43 = vsel %vm973_vm11, %v969_v32, %v977_v39  ;;  %v996_v59 = vmul.f32 %v2073_v41, %v992_v37 }
 0x2d3   : > { %v974_v31 = vsub.f32 0.0, %v966_v36  ;;  %v989_v45 = vadd.f32 1.0, %v981_v43 }
 0x2d4   : > { %v975_v44 = vsub.f32 0.0, %v967_v40 }
 0x2d5   : > { %v978_v46 = vsel %vm970_vm12, %v966_v36, %v974_v31  ;;  %v993_v56 = vmul.f32 %v989_v45, %v985_v35 }
 0x2d6   : > { %v986_v52 = vadd.f32 1.0, %v978_v46  ;;  %v979_v48 = vsel %vm971_vm13, %v967_v40, %v975_v44 }
 0x2d7   : > { %v987_v57 = vadd.f32 1.0, %v979_v48  ;;  %v997_v5 = vmul.f32 %v2073_v41, %v993_v56 }
 0x2d8   : > { %v990_v58 = vmul.f32 %v986_v52, %v982_v47 }
 0x2d9   : > { %v991_v54 = vmul.f32 %v987_v57, %v983_v49  ;;  %v2183_v61 = vpack.c.bf16 %v997_v5, %v996_v59 }
 0x2da   : > { %v994_v60 = vmul.f32 %v2073_v41, %v990_v58 }
 0x2db   : > { %v995_v2 = vmul.f32 %v2073_v41, %v991_v54  ;;  %1049 = vrot.lane.b32.xlu1 %v2183_v61, %s2382_s23  ;;  %v1128_v63 = vmul.bf16 %v2136_v51, %v2183_v61  ;;  %v1016_v4 = vmul.bf16 %v2128_v38, %v2183_v61  ;;  %v1157_v55 = vmul.bf16 %v2140_v53, %v2183_v61 }
 0x2dc   : > { %v1067_v7 = vmul.bf16 %v2152_v12, %v2183_v61 }
 0x2dd   : > { %v998_v10 = vpack.c.bf16 %v995_v2, %v994_v60 }
 0x2df   : > { %1732 = vmatprep.subr.bf16.mxu1 %v998_v10  ;;  %1138 = vrot.lane.b32.xlu1 %v1128_v63, %s1887_s17  ;;  %v1126_v50 = vmul.bf16 %v2136_v51, %v998_v10  ;;  %v1014_v6 = vmul.bf16 %v2128_v38, %v998_v10  ;;  %v1065_v51 = vmul.bf16 %v2152_v12, %v998_v10 }
 0x2e0   : > { %1045 = vrot.lane.b32.xlu0 %v998_v10, %s2382_s23  ;;  %v1155_v38 = vmul.bf16 %v2140_v53, %v998_v10  ;;  %v1204_v53 = vpop.permute.xlu0 %1203 }
 0x2e1   : > { %v1207_v0 = vmul.bf16 0, %v1204_v53 }
 0x2e3   : > { %1134 = vrot.lane.b32.xlu1 %v1126_v50, %s1887_s17  ;;  %s2383_s17 = smov 120  }
 0x2e4   : > { %1027 = vrot.lane.b32.xlu0 %v1016_v4, %s1892_s22 }
 0x2e7   : > { %1169 = vrot.lane.b32.xlu1 %v1156_v3, %s1888_s18  ;;  %v1091_v3 = vpop.permute.xlu1 %1090 }
 0x2e8   : > { %1023 = vrot.lane.b32.xlu0 %v1014_v6, %s1892_s22  ;;  %v1094_v11 = vmul.bf16 %v1091_v3, %v998_v10  ;;  %v1093_v14 = vmul.bf16 0, %v1091_v3  ;;  %v1096_v12 = vmul.bf16 %v1091_v3, %v2183_v61 }
 0x2eb   : > { %1078 = vrot.lane.b32.xlu1 %v1067_v7, %s1891_s21 }
 0x2ec   : > { %1167 = vrot.lane.b32.xlu0 %v1157_v55, %s1888_s18 }
 0x2ef   : > { %1074 = vrot.lane.b32.xlu1 %v1065_v51, %s1891_s21 }
 0x2f0   : > { %1076 = vrot.lane.b32.xlu0 %v1064_v9, %s1891_s21  ;;  %v1208_v9 = vmul.bf16 %v1204_v53, %v2183_v61 }
 0x2f3   : > { %1809 = vrot.lane.b32.xlu1 %v1886_v8, %s2383_s17  ;;  %v1206_v8 = vmul.bf16 %v1204_v53, %v998_v10 }
 0x2f4   : > { %1163 = vrot.lane.b32.xlu0 %v1155_v38, %s1888_s18 }
 0x2f7   : > { %1103 = vrot.lane.b32.xlu1 %v1094_v11, %s1890_s20  ;;  %v1820_v11 = vld [vmem:[%s2369_s5] ss:$12 sps:$4 sm:$0xff]  }
 0x2f8   : > { %1185 = vrot.lane.b32.xlu0 %v998_v10, %s2383_s17 }
 0x2fb   : > { %1105 = vrot.lane.b32.xlu1 %v1093_v14, %s1890_s20 }
 0x2fc   : > { %1101 = vrot.lane.b32.xlu0 %v1093_v14, %s1890_s20 }
 0x2ff   : > { %1214 = vrot.lane.b32.xlu1 %v1206_v8, %s1889_s19 }
 0x300   : > { %1189 = vrot.lane.b32.xlu0 %v2183_v61, %s2383_s17 }
 0x303   : > { %1218 = vrot.lane.b32.xlu1 %v1208_v9, %s1889_s19 }
 0x304   : > { %1107 = vrot.lane.b32.xlu0 %v1096_v12, %s1890_s20 }
 0x307   : > { %1260 = vperm.xlu1 %1802, %v1254_v15   ;;  %v1827_v15 = vld [vmem:[%s2369_s5 + $0x20] ss:$12 sps:$4 sm:$0xff]  }
 0x308   : > { %1216 = vrot.lane.b32.xlu0 %v1207_v0, %s1889_s19 }
 0x30b   : > { %1270 = vperm.xlu1 %1802, %v1256_v16  }
 0x30c   : > { %1220 = vrot.lane.b32.xlu0 %v1207_v0, %s1889_s19  ;;  %v1825_v0 = vld [vmem:[%s2369_s5 + $0x18] ss:$12 sps:$4 sm:$0xff]  }
 0x30e   : > { %v1022_v25 = vpop.permute.xlu1 %1021 }
 0x30f   : > { %1484 = vperm.xlu1 %1802, %v1474_v17  }
 0x310   : > { %1265 = vperm.xlu0 %1801, %v1255_v18  }
 0x312   : > { %v1026_v22 = vpop.permute.xlu1 %1025 }
 0x313   : > { %1489 = vperm.xlu1 %1802, %v1475_v19  }
 0x314   : > { %1275 = vperm.xlu0 %1801, %v1257_v20  }
 0x315   : > { %v1137_v26 = vpop.permute.xlu0 %1136 }
 0x316   : > { %v1805_v27 = vpop.permute.xlu1 %1804 }
 0x317   : > { %1507 = vperm.xlu1 %1802, %v1501_v21   ;;  %v1806_v45 = vunpack.i.l.bf16 %v1805_v27  ;;  %v1807_v52 = vunpack.i.h.bf16 %v1805_v27 }
 0x318   : > { %1479 = vperm.xlu0 %1801, %v1473_v1  }
 0x319   : > { %v1141_v28 = vpop.permute.xlu0 %1140 }
 0x31a   : > { %v1166_v29 = vpop.permute.xlu1 %1165 }
 0x31c   : > { %1494 = vperm.xlu0 %1801, %v1476_v23  }
 0x31d   : > { %v1073_v30 = vpop.permute.xlu0 %1072 }
 0x320   : > { %1512 = vperm.xlu0 %1801, %v1502_v24  }
 0x34d   : > { %v1050_v32 = vpop.permute.xlu1 %1049 }
 0x34e   : > { %v1052_v58 = vsel %vm497_vm6, %v1807_v52, %v1050_v32 }
 0x351   : > { %v1139_v33 = vpop.permute.xlu1 %1138 }
 0x352   : > { %v1046_v34 = vpop.permute.xlu0 %1045  ;;  %v1143_v56 = vsel %vm543_vm0, %v1139_v33, %v1141_v28 }
 0x353   : > { %v1051_v48 = vsel %vm497_vm6, %v1806_v45, %v1046_v34 }
 0x355   : > { %v1135_v36 = vpop.permute.xlu1 %1134 }
 0x356   : > { %v1028_v39 = vpop.permute.xlu0 %1027  ;;  %v1142_v37 = vsel %vm543_vm0, %v1135_v36, %v1137_v26 }
 0x357   : > { %v1030_v44 = vsel %vm480_vm5, %v1026_v22, %v1028_v39 }
 0x359   : > { %v1170_v40 = vpop.permute.xlu1 %1169 }
 0x35a   : > { %v1024_v42 = vpop.permute.xlu0 %1023 }
 0x35b   : > { %v1029_v31 = vsel %vm480_vm5, %v1022_v25, %v1024_v42 }
 0x35c   : > { %1733 = vmatpush3.bf16.msra.mxu1 %v1029_v31 }
 0x35d   : > { %1734 = vmatprep.subr.bf16.mxu1 %v2183_v61  ;;  %v1079_v43 = vpop.permute.xlu1 %1078 }
 0x35e   : > { %v1168_v35 = vpop.permute.xlu0 %1167 }
 0x35f   : > { %v1172_v2 = vsel %vm520_vm1, %v1168_v35, %v1170_v40 }
 0x360   : > { %1735 = vmatpush3.bf16.msra.mxu1 %v1030_v44 }
 0x361   : > { %1736 = vmatprep.subr.bf16.mxu1 %v1142_v37  ;;  %v1075_v46 = vpop.permute.xlu1 %1074 }
 0x362   : > { %v1077_v47 = vpop.permute.xlu0 %1076  ;;  %v1080_v54 = vsel %vm535_vm4, %v1073_v30, %v1075_v46 }
 0x363   : > { %v1081_v63 = vsel %vm535_vm4, %v1077_v47, %v1079_v43 }
 0x364   : > { %1737 = vmatpush3.bf16.msra.mxu1 %v1051_v48 }
 0x365   : > { %1738 = vmatprep.subr.bf16.mxu1 %v1143_v56  ;;  %v1810_v49 = vpop.permute.xlu1 %1809 }
 0x366   : > { %v1164_v57 = vpop.permute.xlu0 %1163  ;;  %v1811_v60 = vunpack.i.l.bf16 %v1810_v49  ;;  %v1812_v50 = vunpack.i.h.bf16 %v1810_v49 }
 0x367   : > { %v1171_v59 = vsel %vm520_vm1, %v1164_v57, %v1166_v29 }
 0x368   : > { %1739 = vmatpush3.bf16.msra.mxu1 %v1052_v58  ;;  %v1503_v58 = vld [vmem:[%s2372_s8 + $0x10] sm:$0xff] }
 0x369   : > { %1740 = vmatprep.subr.bf16.mxu1 %v1171_v59  ;;  %v1104_v61 = vpop.permute.xlu1 %1103 }
 0x36a   : > { %v1186_v5 = vpop.permute.xlu0 %1185 }
 0x36b   : > { %v1193_v4 = vsel %vm621_vm8, %v1186_v5, %v1811_v60 }
 0x36c   : > { %1741 = vmatpush3.bf16.msra.mxu1 %v1080_v54 }
 0x36d   : > { %1742 = vmatprep.subr.bf16.mxu1 %v1172_v2  ;;  %v1106_v6 = vpop.permute.xlu1 %1105 }
 0x36e   : > { %v1102_v10 = vpop.permute.xlu0 %1101 }
 0x36f   : > { %v1109_v7 = vsel %vm559_vm3, %v1102_v10, %v1104_v61 }
 0x370   : > { %1743 = vmatpush3.bf16.msra.mxu1 %v1081_v63 }
 0x371   : > { %1744 = vmatprep.subr.bf16.mxu1 %v1193_v4  ;;  %v1215_v14 = vpop.permute.xlu1 %1214 }
 0x372   : > { %v1190_v55 = vpop.permute.xlu0 %1189 }
 0x373   : > { %v1194_v51 = vsel %vm621_vm8, %v1190_v55, %v1812_v50 }
 0x374   : > { %1745 = vmatpush3.bf16.msra.mxu1 %v1109_v7 }
 0x375   : > { %1746 = vmatprep.subr.bf16.mxu1 %v1194_v51  ;;  %v1219_v12 = vpop.permute.xlu1 %1218 }
 0x376   : > { %v1108_v38 = vpop.permute.xlu0 %1107 }
 0x377   : > { %v1110_v3 = vsel %vm559_vm3, %v1106_v6, %v1108_v38 }
 0x378   : > { %1747 = vmatpush3.bf16.msra.mxu1 %v1110_v3 }
 0x37a   : > { %v1217_v53 = vpop.permute.xlu0 %1216 }
 0x37b   : > { %1348 = vmatmul.mubr.bf16.vlgmr.msra.gmra.mrb[0].mxu1 %v1820_v11  ;;  %v1222_v8 = vsel %vm465_vm2, %v1215_v14, %v1217_v53 }
 0x37c   : > { %1774 = vmatprep.subr.bf16.mxu0 %v1222_v8  ;;  %1355 = vmatprep.mubr.bf16.mxu1 %v1823_v62 }
 0x37d   : > { %1775 = vmatpush3.bf16.msra.mxu0 %v1222_v8 }
 0x37e   : > { %v1221_v9 = vpop.permute.xlu0 %1220 }
 0x37f   : > { %v1223_v13 = vsel %vm465_vm2, %v1219_v12, %v1221_v9 }
 0x380   : > { %1776 = vmatprep.subr.bf16.mxu0 %v1223_v13 }
 0x381   : > { %1777 = vmatpush3.bf16.msra.mxu0 %v1223_v13 }
 0x383   : > { %1356 = vmatmul.mubr.bf16.gmra.mrb[4].mxu1 %v1825_v0 }
 0x384   : > { %1779 = vmatmul.mubr.msk.bf16.vlgmr.msra.gmra.mrb[4].mxu0 %vm1308_vm14, %v1827_v15 }
 0x386   : > { %v1261_v18 = vpop.permute.xlu1 %1260 }
 0x38a   : > { %v1271_v24 = vpop.permute.xlu1 %1270 }
 0x38e   : > { %v1485_v59 = vpop.permute.xlu1 %1484 }
 0x38f   : > { %v1266_v23 = vpop.permute.xlu0 %1265 }
 0x392   : > { %v2327_v54 = vpop.permute.xlu1 %1489 }
 0x393   : > { %v1276_v31 = vpop.permute.xlu0 %1275 }
 0x396   : > { %v1508_v61 = vpop.permute.xlu1 %1507 }
 0x397   : > { %v1480_v5 = vpop.permute.xlu0 %1479 }
 0x39b   : > { %v1495_v60 = vpop.permute.xlu0 %1494 }
 0x39f   : > { %v1513_v2 = vpop.permute.xlu0 %1512 }
 0x44e   : > { %v1748_v16 = vpop.f32.mrb[0].mxu1 }
 0x44f   : > { %v1749_v17 = vpop.f32.mrb[1].mxu1 }
 0x450   : > { %v1750_v19 = vadd.f32 %v1749_v17, %v1748_v16  ;;  %v1751_v20 = vpop.f32.mrb[2].mxu1 }
 0x451   : > { %v1752_v21 = vpop.f32.mrb[3].mxu1 }
 0x452   : > { %v1753_v1 = vadd.f32 %v1752_v21, %v1751_v20  ;;  %v1350_v27 = vadd.f32 %v1750_v19, %v1261_v18 }
 0x454   : > { %v1353_v36 = vadd.f32 %v1753_v1, %v1266_v23 }
 0x456   : > { %v1754_v25 = vpop.f32.mrb[4].mxu1 }
 0x457   : > { %v1755_v22 = vpop.f32.mrb[5].mxu1  ;;  %v1780_v26 = vpop.f32.mrb[4].mxu0 }
 0x458   : > { %v1756_v28 = vadd.f32 %v1755_v22, %v1754_v25  ;;  %v1757_v29 = vpop.f32.mrb[6].mxu1  ;;  %v1398_v30 = vpop.f32.mrb[5].mxu0 }
 0x459   : > { %v1399_v32 = vadd.f32 %v1398_v30, %v1350_v27  ;;  %v1758_v33 = vpop.f32.mrb[7].mxu1  ;;  %v1781_v34 = vpop.f32.mrb[6].mxu0 }
 0x45a   : > { %v1358_v39 = vadd.f32 %v1756_v28, %v1271_v24  ;;  %v1759_v40 = vadd.f32 %v1758_v33, %v1757_v29  ;;  %v1401_v42 = vpop.f32.mrb[7].mxu0 }
 0x45b   : > { %v2298_v43 = vmul.f32 %v2073_v41, %v1399_v32  ;;  %v1402_v35 = vadd.f32 %v1401_v42, %v1353_v36 }
 0x45c   : > { %v1407_v44 = vadd.f32 %v1780_v26, %v1358_v39  ;;  %v1361_v37 = vadd.f32 %v1759_v40, %v1276_v31 }
 0x45d   : > { %v2301_v45 = vmul.f32 %v2073_v41, %v1402_v35  ;;  %1417 = vadd.xlane.f32.xlu1 %v2298_v43  ;;  %v1425_v52 = vmul.f32 %v2298_v43, %v2298_v43 }
 0x45e   : > { %v1410_v46 = vadd.f32 %v1781_v34, %v1361_v37  ;;  %v2313_v56 = vmul.f32 %v2073_v41, %v1407_v44 }
 0x45f   : > { %1419 = vadd.xlane.f32.xlu0 %v2301_v45  ;;  %v1426_v47 = vmul.f32 %v2301_v45, %v2301_v45 }
 0x460   : > { %v2310_v48 = vmul.f32 %v2073_v41, %v1410_v46  ;;  %v1427_v57 = vmul.f32 %v2313_v56, %v2313_v56  ;;  %v1504_v41 = vld [vmem:[%s2372_s8 + $0x18] sm:$0xff] }
 0x461   : > { %1431 = vadd.xlane.f32.xlu1 %v1426_v47 }
 0x462   : > { %v1428_v49 = vmul.f32 %v2310_v48, %v2310_v48 }
 0x463   : > { %1429 = vadd.xlane.f32.xlu0 %v1425_v52 }
 0x465   : > { %1423 = vadd.xlane.f32.xlu1 %v2310_v48 }
 0x467   : > { %1421 = vadd.xlane.f32.xlu0 %v2313_v56 }
 0x469   : > { %1435 = vadd.xlane.f32.xlu1 %v1428_v49 }
 0x46b   : > { %1433 = vadd.xlane.f32.xlu0 %v1427_v57 }
 0x47a   : > { %1517 = vperm.xlu1 %1802, %v1503_v58  }
 0x481   : > { %1522 = vperm.xlu0 %1801, %v1504_v41  }
 0x4ea   : > { %v1418_v10 = vpop.xlane.xlu1 %1417 }
 0x4eb   : > { %v1437_v4 = vmul.f32 0.015625, %v1418_v10 }
 0x4ec   : > { %v1420_v63 = vpop.xlane.xlu0 %1419 }
 0x4ed   : > { %v1438_v50 = vmul.f32 0.015625, %v1420_v63  ;;  %v1445_v38 = vmul.f32 %v1437_v4, %v1437_v4  ;;  %v1457_v29 = vsub.f32 %v2298_v43, %v1437_v4 }
 0x4ee   : > { %v1432_v6 = vpop.xlane.xlu1 %1431 }
 0x4ef   : > { %v1446_v55 = vmul.f32 %v1438_v50, %v1438_v50  ;;  %v1442_v7 = vmul.f32 0.015625, %v1432_v6  ;;  %v1458_v27 = vsub.f32 %v2301_v45, %v1438_v50 }
 0x4f0   : > { %v1430_v51 = vpop.xlane.xlu0 %1429 }
 0x4f1   : > { %v1450_v3 = vsub.f32 %v1442_v7, %v1446_v55  ;;  %v1441_v11 = vmul.f32 0.015625, %v1430_v51 }
 0x4f2   : > { %v1424_v14 = vpop.xlane.xlu1 %1423 }
 0x4f3   : > { %v1454_v62 = vmax.f32 %v1450_v3, 0.0  ;;  %v1449_v53 = vsub.f32 %v1441_v11, %v1445_v38  ;;  %v1440_v8 = vmul.f32 0.015625, %v1424_v14 }
 0x4f4   : > { %v1422_v12 = vpop.xlane.xlu0 %1421 }
 0x4f5   : > { %v1462_v9 = vadd.f32 1e-05, %v1454_v62  ;;  %v1453_v13 = vmax.f32 %v1449_v53, 0.0  ;;  %v1439_v0 = vmul.f32 0.015625, %v1422_v12  ;;  %v1448_v17 = vmul.f32 %v1440_v8, %v1440_v8 }
 0x4f6   : > { %v1436_v15 = vpop.xlane.xlu1 %1435  ;;  %v1460_v35 = vsub.f32 %v2310_v48, %v1440_v8 }
 0x4f7   : > { %1852 = vrsqrt.f32 %v1462_v9  ;;  %v1461_v16 = vadd.f32 1e-05, %v1453_v13  ;;  %v1444_v18 = vmul.f32 0.015625, %v1436_v15  ;;  %v1447_v20 = vmul.f32 %v1439_v0, %v1439_v0 }
 0x4f8   : > { %v1434_v19 = vpop.xlane.xlu0 %1433  ;;  %v1459_v45 = vsub.f32 %v2313_v56, %v1439_v0 }
 0x4f9   : > { %1854 = vrsqrt.f32 %v1461_v16  ;;  %v1452_v21 = vsub.f32 %v1444_v18, %v1448_v17  ;;  %v1443_v1 = vmul.f32 0.015625, %v1434_v19 }
 0x4fb   : > { %v1456_v23 = vmax.f32 %v1452_v21, 0.0  ;;  %v1451_v24 = vsub.f32 %v1443_v1, %v1447_v20 }
 0x4fd   : > { %v1464_v25 = vadd.f32 1e-05, %v1456_v23  ;;  %v1455_v22 = vmax.f32 %v1451_v24, 0.0 }
 0x4ff   : > { %1856 = vrsqrt.f32 %v1464_v25  ;;  %v1463_v26 = vadd.f32 1e-05, %v1455_v22 }
 0x501   : > { %v1853_v28 = vpop.eup %1852  ;;  %1858 = vrsqrt.f32 %v1463_v26 }
 0x502   : > { %v1470_v30 = vmul.f32 %v1853_v28, %v1458_v27 }
 0x503   : > { %v1855_v32 = vpop.eup %1854 }
 0x504   : > { %v1498_v33 = vmul.f32 %v1485_v59, %v1470_v30  ;;  %v1469_v34 = vmul.f32 %v1855_v32, %v1457_v29  ;;  %v1523_v59 = vpop.permute.xlu0 %1522 }
 0x506   : > { %v2331_v36 = vadd.f32 %v1513_v2, %v1498_v33  ;;  %v1497_v39 = vmul.f32 %v1480_v5, %v1469_v34  ;;  %v1518_v2 = vpop.permute.xlu1 %1517 }
 0x508   : > { %v1530_v40 = vand.u32 2147483647, %v2331_v36  ;;  %v2334_v42 = vadd.f32 %v1508_v61, %v1497_v39  ;;  %vm1614_vm15 = vcmp.ge.f32.partialorder %v2331_v36, 0.0 }
 0x509   : > { %v1857_v31 = vpop.eup %1856 }
 0x50a   : > { %v1534_v44 = vmul.f32 0.70710677, %v1530_v40  ;;  %v1529_v37 = vand.u32 2147483647, %v2334_v42  ;;  %v1472_v46 = vmul.f32 %v1857_v31, %v1460_v35  ;;  %vm1613_vm0 = vcmp.ge.f32.partialorder %v2334_v42, 0.0 }
 0x50b   : > { %v1859_v43 = vpop.eup %1858 }
 0x50c   : > { %v1538_v47 = vmul.f32 0.3275911, %v1534_v44  ;;  %v1533_v52 = vmul.f32 0.70710677, %v1529_v37  ;;  %v1471_v49 = vmul.f32 %v1859_v43, %v1459_v45  ;;  %v1500_v57 = vmul.f32 %v1495_v60, %v1472_v46 }
 0x50d   : > { %v1590_v60 = vsub.f32 0.0, %v1534_v44 }
 0x50e   : > { %v1542_v58 = vadd.f32 1.0, %v1538_v47  ;;  %v1537_v41 = vmul.f32 0.3275911, %v1533_v52  ;;  %v1499_v5 = vmul.f32 %v2327_v54, %v1471_v49  ;;  %v2340_v61 = vadd.f32 %v1523_v59, %v1500_v57 }
 0x50f   : > { %v1589_v51 = vsub.f32 0.0, %v1533_v52  ;;  %v1594_v3 = vmul.f32 %v1590_v60, %v1534_v44 }
 0x510   : > { %1860 = vrcp.f32 %v1542_v58  ;;  %v1541_v48 = vadd.f32 1.0, %v1537_v41  ;;  %v2342_v10 = vadd.f32 %v1518_v2, %v1499_v5  ;;  %v1532_v56 = vand.u32 2147483647, %v2340_v61 }
 0x511   : > { %v1593_v62 = vmul.f32 %v1589_v51, %v1533_v52  ;;  %v1599_v8 = vmul.f32 1.442695, %v1594_v3  ;;  %vm1616_vm1 = vcmp.ge.f32.partialorder %v2340_v61, 0.0 }
 0x512   : > { %1862 = vrcp.f32 %v1541_v48  ;;  %v1531_v63 = vand.u32 2147483647, %v2342_v10  ;;  %v1536_v4 = vmul.f32 0.70710677, %v1532_v56  ;;  %vm1615_vm2 = vcmp.ge.f32.partialorder %v2342_v10, 0.0 }
 0x513   : > { %v1597_v15 = vmul.f32 1.442695, %v1593_v62 }
 0x514   : > { %v1535_v50 = vmul.f32 0.70710677, %v1531_v63  ;;  %v1540_v6 = vmul.f32 0.3275911, %v1536_v4  ;;  %v1592_v0 = vsub.f32 0.0, %v1536_v4 }
 0x516   : > { %v1539_v55 = vmul.f32 0.3275911, %v1535_v50  ;;  %v1544_v7 = vadd.f32 1.0, %v1540_v6  ;;  %v1591_v17 = vsub.f32 0.0, %v1535_v50  ;;  %v1596_v1 = vmul.f32 %v1592_v0, %v1536_v4 }
 0x517   : > { %v1626_v6 = vmul.f32 0.5, %v2331_v36 }
 0x518   : > { %v1543_v54 = vadd.f32 1.0, %v1539_v55  ;;  %1864 = vrcp.f32 %v1544_v7  ;;  %v1595_v25 = vmul.f32 %v1591_v17, %v1535_v50  ;;  %v1603_v33 = vmul.f32 1.442695, %v1596_v1 }
 0x51a   : > { %v1861_v38 = vpop.eup %1860  ;;  %1866 = vrcp.f32 %v1543_v54  ;;  %v1601_v39 = vmul.f32 1.442695, %v1595_v25 }
 0x51b   : > { %v1554_v11 = vmul.f32 1.0614054, %v1861_v38  ;;  %1868 = vpow2.f32 %v1599_v8 }
 0x51c   : > { %v1863_v14 = vpop.eup %1862  ;;  %1870 = vpow2.f32 %v1597_v15 }
 0x51d   : > { %v1558_v53 = vadd.f32 -1.4531521, %v1554_v11  ;;  %v1553_v12 = vmul.f32 1.0614054, %v1863_v14  ;;  %1872 = vpow2.f32 %v1603_v33 }
 0x51e   : > { %1874 = vpow2.f32 %v1601_v39 }
 0x51f   : > { %v1562_v9 = vmul.f32 %v1861_v38, %v1558_v53  ;;  %v1557_v13 = vadd.f32 -1.4531521, %v1553_v12  ;;  %v1625_v53 = vmul.f32 0.5, %v2334_v42 }
 0x521   : > { %v1566_v16 = vadd.f32 1.4214138, %v1562_v9  ;;  %v1561_v18 = vmul.f32 %v1863_v14, %v1557_v13  ;;  %v1876_v9 = vld [vmem:[%s2376_s12] ss:$0 sm:$0xff] }
 0x522   : > { %v1865_v20 = vpop.eup %1864 }
 0x523   : > { %v1570_v19 = vmul.f32 %v1861_v38, %v1566_v16  ;;  %v1565_v21 = vadd.f32 1.4214138, %v1561_v18  ;;  %v1556_v22 = vmul.f32 1.0614054, %v1865_v20 }
 0x524   : > { %v1867_v23 = vpop.eup %1866 }
 0x525   : > { %v1574_v24 = vadd.f32 -0.28449672, %v1570_v19  ;;  %v1555_v26 = vmul.f32 1.0614054, %v1867_v23  ;;  %v1569_v27 = vmul.f32 %v1863_v14, %v1565_v21  ;;  %v1560_v29 = vadd.f32 -1.4531521, %v1556_v22  ;;  %v1869_v45 = vpop.eup %1868 }
 0x526   : > { %v1871_v58 = vpop.eup %1870  ;;  %v1628_v21 = vmul.f32 0.5, %v2340_v61 }
 0x527   : > { %v1578_v28 = vmul.f32 %v1861_v38, %v1574_v24  ;;  %v1559_v30 = vadd.f32 -1.4531521, %v1555_v26  ;;  %v1573_v32 = vadd.f32 -0.28449672, %v1569_v27  ;;  %v1564_v40 = vmul.f32 %v1865_v20, %v1560_v29 }
 0x529   : > { %v1582_v34 = vadd.f32 0.2548296, %v1578_v28  ;;  %v1563_v31 = vmul.f32 %v1867_v23, %v1559_v30  ;;  %v1577_v35 = vmul.f32 %v1863_v14, %v1573_v32  ;;  %v1568_v37 = vadd.f32 1.4214138, %v1564_v40 }
 0x52b   : > { %v1586_v44 = vmul.f32 %v1861_v38, %v1582_v34  ;;  %v1567_v43 = vadd.f32 1.4214138, %v1563_v31  ;;  %v1581_v46 = vadd.f32 0.2548296, %v1577_v35  ;;  %v1572_v52 = vmul.f32 %v1865_v20, %v1568_v37  ;;  %v1873_v38 = vpop.eup %1872 }
 0x52c   : > { %v1875_v62 = vpop.eup %1874 }
 0x52d   : > { %v1606_v47 = vmul.f32 %v1869_v45, %v1586_v44  ;;  %v1571_v49 = vmul.f32 %v1867_v23, %v1567_v43  ;;  %v1585_v57 = vmul.f32 %v1863_v14, %v1581_v46  ;;  %v1576_v59 = vadd.f32 -0.28449672, %v1572_v52 }
 0x52f   : > { %v1610_v41 = vsub.f32 1.0, %v1606_v47  ;;  %v1575_v5 = vadd.f32 -0.28449672, %v1571_v49  ;;  %v1605_v48 = vmul.f32 %v1871_v58, %v1585_v57  ;;  %v1580_v56 = vmul.f32 %v1865_v20, %v1576_v59 }
 0x531   : > { %v1618_v2 = vsub.f32 0.0, %v1610_v41  ;;  %v1579_v63 = vmul.f32 %v1867_v23, %v1575_v5  ;;  %v1609_v4 = vsub.f32 1.0, %v1605_v48  ;;  %v1584_v60 = vadd.f32 0.2548296, %v1580_v56 }
 0x533   : > { %v1622_v50 = vsel %vm1614_vm15, %v1610_v41, %v1618_v2  ;;  %v1583_v55 = vadd.f32 0.2548296, %v1579_v63  ;;  %v1617_v7 = vsub.f32 0.0, %v1609_v4  ;;  %v1588_v54 = vmul.f32 %v1865_v20, %v1584_v60 }
 0x534   : > { %v1630_v51 = vadd.f32 1.0, %v1622_v50 }
 0x535   : > { %v1587_v3 = vmul.f32 %v1867_v23, %v1583_v55  ;;  %v1621_v11 = vsel %vm1613_vm0, %v1609_v4, %v1617_v7  ;;  %v1608_v36 = vmul.f32 %v1873_v38, %v1588_v54  ;;  %v1627_v23 = vmul.f32 0.5, %v2342_v10 }
 0x536   : > { %v1634_v14 = vmul.f32 %v1630_v51, %v1626_v6  ;;  %v1629_v8 = vadd.f32 1.0, %v1621_v11 }
 0x537   : > { %v1607_v12 = vmul.f32 %v1875_v62, %v1587_v3  ;;  %v1612_v15 = vsub.f32 1.0, %v1608_v36 }
 0x538   : > { %v1638_v13 = vmul.f32 %v1876_v9, %v1634_v14  ;;  %v1633_v0 = vmul.f32 %v1629_v8, %v1625_v53 }
 0x539   : > { %v1611_v16 = vsub.f32 1.0, %v1607_v12  ;;  %v1620_v18 = vsub.f32 0.0, %v1612_v15 }
 0x53a   : > { %1642 = vst [vmem:[%s437_s14 + $0x8] sm:$0xff] %v1638_v13  ;;  %v1637_v17 = vmul.f32 %v1876_v9, %v1633_v0 }
 0x53b   : > { %v1619_v19 = vsub.f32 0.0, %v1611_v16  ;;  %v1624_v42 = vsel %vm1616_vm1, %v1612_v15, %v1620_v18 }
 0x53c   : > { %1641 = vst [vmem:[%s437_s14] sm:$0xff] %v1637_v17  ;;  %v1632_v1 = vadd.f32 1.0, %v1624_v42 }
 0x53d   : > { %v1623_v20 = vsel %vm1615_vm2, %v1611_v16, %v1619_v19 }
 0x53e   : > { %v1631_v24 = vadd.f32 1.0, %v1623_v20  ;;  %v1636_v25 = vmul.f32 %v1632_v1, %v1628_v21 }
 0x540   : > { %v1635_v22 = vmul.f32 %v1631_v24, %v1627_v23  ;;  %v1640_v26 = vmul.f32 %v1876_v9, %v1636_v25 }
 0x542   : > { %v1639_v27 = vmul.f32 %v1876_v9, %v1635_v22  ;;  %1644 = vst [vmem:[%s437_s14 + $0x18] sm:$0xff] %v1640_v26 }
 0x544   : > { %1643 = vst [vmem:[%s437_s14 + $0x10] sm:$0xff] %v1639_v27 }
 0x545 PF: > { %s23_s25 = sadd.s32 1, %s1883_s25  }
 0x546   : > { %p20_p4 = scmp.ge.s32.totalorder %s23_s25, 4  }
 0x548   :  { %22 = sbr.rel (!%p20_p4) target bundleno = 1 (0x1), region = 102 }

</bundles_post_ra>
